<compile_context>
chip_gen: v7x
topology: tpu7x:2x2x1
jax: 0.10.0
libtpu: 0.0.40
codegen_flags: <defaults>
</compile_context>

<pallas_src>
import jax
import jax.numpy as jnp
import numpy as np
from jax.experimental import pallas as pl
from jax.experimental.pallas import tpu as pltpu

KSIZE = 7
PAD = KSIZE // 2


def attention_kernel(x_ref, w_ref, b_ref, o_ref, pa_ref, pm_ref):
    # x_ref : (1, C, H, W) VMEM block (one batch element)
    # w_ref : (2*7*7,) f32 SMEM  -- conv weights flattened as [in_ch, kh, kw]
    # b_ref : (1,)     f32 SMEM  -- conv bias
    # pa_ref, pm_ref : (H+6, W+6) f32 VMEM scratch (zero-padded pooled maps)
    _, _, H, W = x_ref.shape

    x = x_ref[0].astype(jnp.float32)                       # (C, H, W)

    # Channel pooling (PyTorch dim=1 == axis 0 here).
    avg = jnp.mean(x, axis=0)                              # (H, W)
    mx = jnp.max(x, axis=0)                                # (H, W)

    # Zero-padded pooled maps for the 7x7 'same' convolution.
    pa_ref[...] = jnp.zeros_like(pa_ref)
    pm_ref[...] = jnp.zeros_like(pm_ref)
    pa_ref[PAD:PAD + H, PAD:PAD + W] = avg
    pm_ref[PAD:PAD + H, PAD:PAD + W] = mx

    # conv2d(2 -> 1, k=7, padding=3) as 98 shifted, scalar-weighted adds.
    acc = jnp.zeros((H, W), jnp.float32) + b_ref[0]
    for dy in range(KSIZE):
        for dx in range(KSIZE):
            w_avg = w_ref[dy * KSIZE + dx]                 # weight for avg map
            w_max = w_ref[KSIZE * KSIZE + dy * KSIZE + dx]  # weight for max map
            acc = acc + w_avg * pa_ref[dy:dy + H, dx:dx + W]
            acc = acc + w_max * pm_ref[dy:dy + H, dx:dx + W]

    attn = 1.0 / (1.0 + jnp.exp(-acc))                     # sigmoid, (H, W)
    o_ref[0] = (x * attn[None, :, :]).astype(o_ref.dtype)


def attention_layer(x, conv_w, conv_b):
    """x: (B, C, H, W); conv_w: (1, 2, 7, 7); conv_b: (1,) -> (B, C, H, W)."""
    B, C, H, W = x.shape
    w_flat = conv_w.reshape(-1).astype(jnp.float32)        # (98,), [in, kh, kw]
    b_flat = conv_b.reshape(-1).astype(jnp.float32)        # (1,)

    return pl.pallas_call(
        attention_kernel,
        out_shape=jax.ShapeDtypeStruct((B, C, H, W), x.dtype),
        grid_spec=pltpu.PrefetchScalarGridSpec(
            num_scalar_prefetch=0,
            grid=(B,),
            in_specs=[
                pl.BlockSpec((1, C, H, W), lambda b: (b, 0, 0, 0)),
                pl.BlockSpec(memory_space=pltpu.MemorySpace.SMEM),
                pl.BlockSpec(memory_space=pltpu.MemorySpace.SMEM),
            ],
            out_specs=pl.BlockSpec((1, C, H, W), lambda b: (b, 0, 0, 0)),
            scratch_shapes=[
                pltpu.VMEM((H + 2 * PAD, W + 2 * PAD), jnp.float32),
                pltpu.VMEM((H + 2 * PAD, W + 2 * PAD), jnp.float32),
            ],
        ),
        compiler_params=pltpu.CompilerParams(
            dimension_semantics=("parallel",)),
    )(x, w_flat, b_flat)


def attention_layer_ref(x, conv_w, conv_b):
    # Pure-JAX reference mirroring the PyTorch AttentionLayer forward.
    avg = jnp.mean(x, axis=1, keepdims=True)
    mx = jnp.max(x, axis=1, keepdims=True)
    s = jnp.concatenate([avg, mx], axis=1)                 # (B, 2, H, W)
    conv = jax.lax.conv_general_dilated(
        s, conv_w, window_strides=(1, 1),
        padding=((PAD, PAD), (PAD, PAD)),
        dimension_numbers=("NCHW", "OIHW", "NCHW"),
    ) + conv_b.reshape(1, -1, 1, 1)
    return x * jax.nn.sigmoid(conv)


if __name__ == "__main__":
    key = jax.random.PRNGKey(0)
    kx, kw, kb = jax.random.split(key, 3)

    B, C, H, W = 2, 4, 16, 16
    x = jax.random.normal(kx, (B, C, H, W), dtype=jnp.float32)

    # Conv2d(2, 1, kernel_size=7) parameters (PyTorch-style uniform init bound).
    bound = 1.0 / np.sqrt(2 * KSIZE * KSIZE)
    conv_w = jax.random.uniform(kw, (1, 2, KSIZE, KSIZE), jnp.float32, -bound, bound)
    conv_b = jax.random.uniform(kb, (1,), jnp.float32, -bound, bound)

    out = jax.block_until_ready(attention_layer(x, conv_w, conv_b))
    ref = jax.block_until_ready(attention_layer_ref(x, conv_w, conv_b))

    assert out.shape == x.shape, f"bad shape {out.shape}"
    np.testing.assert_allclose(np.asarray(out), np.asarray(ref),
                               rtol=1e-5, atol=1e-5)
    print("KERNEL_OK")
</pallas_src>

<mosaic_0001>
module attributes {stable_mosaic.version = 11 : i64} {
  func.func @attention_kernel(%arg0: i32, %arg1: memref<1x4x16x16xf32, #tpu.memory_space<vmem>>, %arg2: memref<98xf32, #tpu.memory_space<smem>>, %arg3: memref<1xf32, #tpu.memory_space<smem>>, %arg4: memref<1x4x16x16xf32, #tpu.memory_space<vmem>>, %arg5: memref<22x22xf32, #tpu.memory_space<vmem>>, %arg6: memref<22x22xf32, #tpu.memory_space<vmem>>) attributes {dimension_semantics = [#tpu.dimension_semantics<parallel>], iteration_bounds = array<i64: 2>, scalar_prefetch = 0 : i64, scratch_operands = 2 : i64, tpu.core_type = #tpu.core_type<tc>, window_params = [{transform_indices = @transform_0, window_bounds = array<i64: 1, 4, 16, 16>}, {transform_indices = @transform_1, window_bounds = array<i64: 98>}, {transform_indices = @transform_2, window_bounds = array<i64: 1>}, {transform_indices = @transform_3, window_bounds = array<i64: 1, 4, 16, 16>}]} {
    %c0 = arith.constant 0 : index
    %c0_0 = arith.constant 0 : index
    %c0_1 = arith.constant 0 : index
    %c0_2 = arith.constant 0 : index
    %0 = vector.load %arg1[%c0, %c0_0, %c0_1, %c0_2] : memref<1x4x16x16xf32, #tpu.memory_space<vmem>>, vector<1x4x16x16xf32>
    %1 = vector.shape_cast %0 : vector<1x4x16x16xf32> to vector<4x16x16xf32>
    %cst = arith.constant dense<0.000000e+00> : vector<16x16xf32>
    %2 = vector.multi_reduction <add>, %1, %cst [0] : vector<4x16x16xf32> to vector<16x16xf32>
    %cst_3 = arith.constant 4.000000e+00 : f32
    %3 = vector.broadcast %cst_3 : f32 to vector<16x16xf32>
    %4 = arith.divf %2, %3 : vector<16x16xf32>
    %cst_4 = arith.constant dense<0xFF800000> : vector<16x16xf32>
    %5 = vector.multi_reduction <maximumf>, %1, %cst_4 [0] : vector<4x16x16xf32> to vector<16x16xf32>
    %cst_5 = arith.constant 0.000000e+00 : f32
    %6 = vector.broadcast %cst_5 : f32 to vector<22x22xf32>
    %c0_6 = arith.constant 0 : index
    %c0_7 = arith.constant 0 : index
    %7 = vector.load %arg5[%c0_6, %c0_7] : memref<22x22xf32, #tpu.memory_space<vmem>>, vector<22x22xf32>
    tpu.vector_store %arg5[%c0_6, %c0_7], %6 {strides = array<i32>} : memref<22x22xf32, #tpu.memory_space<vmem>>, vector<22x22xf32>,
    %cst_8 = arith.constant 0.000000e+00 : f32
    %8 = vector.broadcast %cst_8 : f32 to vector<22x22xf32>
    %c0_9 = arith.constant 0 : index
    %c0_10 = arith.constant 0 : index
    %9 = vector.load %arg6[%c0_9, %c0_10] : memref<22x22xf32, #tpu.memory_space<vmem>>, vector<22x22xf32>
    tpu.vector_store %arg6[%c0_9, %c0_10], %8 {strides = array<i32>} : memref<22x22xf32, #tpu.memory_space<vmem>>, vector<22x22xf32>,
    %c3 = arith.constant 3 : index
    %c3_11 = arith.constant 3 : index
    %10 = vector.load %arg5[%c3, %c3_11] : memref<22x22xf32, #tpu.memory_space<vmem>>, vector<16x16xf32>
    tpu.vector_store %arg5[%c3, %c3_11], %4 {strides = array<i32>} : memref<22x22xf32, #tpu.memory_space<vmem>>, vector<16x16xf32>,
    %c3_12 = arith.constant 3 : index
    %c3_13 = arith.constant 3 : index
    %11 = vector.load %arg6[%c3_12, %c3_13] : memref<22x22xf32, #tpu.memory_space<vmem>>, vector<16x16xf32>
    tpu.vector_store %arg6[%c3_12, %c3_13], %5 {strides = array<i32>} : memref<22x22xf32, #tpu.memory_space<vmem>>, vector<16x16xf32>,
    %cst_14 = arith.constant 0.000000e+00 : f32
    %12 = vector.broadcast %cst_14 : f32 to vector<16x16xf32>
    %c0_15 = arith.constant 0 : index
    %13 = memref.load %arg3[%c0_15] : memref<1xf32, #tpu.memory_space<smem>>
    %14 = vector.broadcast %13 : f32 to vector<16x16xf32>
    %15 = arith.addf %12, %14 : vector<16x16xf32>
    %c0_16 = arith.constant 0 : index
    %16 = memref.load %arg2[%c0_16] : memref<98xf32, #tpu.memory_space<smem>>
    %c49 = arith.constant 49 : index
    %17 = memref.load %arg2[%c49] : memref<98xf32, #tpu.memory_space<smem>>
    %c0_17 = arith.constant 0 : index
    %c0_18 = arith.constant 0 : index
    %18 = vector.load %arg5[%c0_17, %c0_18] : memref<22x22xf32, #tpu.memory_space<vmem>>, vector<16x16xf32>
    %19 = vector.broadcast %16 : f32 to vector<16x16xf32>
    %20 = arith.mulf %19, %18 : vector<16x16xf32>
    %21 = arith.addf %15, %20 : vector<16x16xf32>
    %c0_19 = arith.constant 0 : index
    %c0_20 = arith.constant 0 : index
    %22 = vector.load %arg6[%c0_19, %c0_20] : memref<22x22xf32, #tpu.memory_space<vmem>>, vector<16x16xf32>
    %23 = vector.broadcast %17 : f32 to vector<16x16xf32>
    %24 = arith.mulf %23, %22 : vector<16x16xf32>
    %25 = arith.addf %21, %24 : vector<16x16xf32>
    %c1 = arith.constant 1 : index
    %26 = memref.load %arg2[%c1] : memref<98xf32, #tpu.memory_space<smem>>
    %c50 = arith.constant 50 : index
    %27 = memref.load %arg2[%c50] : memref<98xf32, #tpu.memory_space<smem>>
    %c0_21 = arith.constant 0 : index
    %c1_22 = arith.constant 1 : index
    %28 = vector.load %arg5[%c0_21, %c1_22] : memref<22x22xf32, #tpu.memory_space<vmem>>, vector<16x16xf32>
    %29 = vector.broadcast %26 : f32 to vector<16x16xf32>
    %30 = arith.mulf %29, %28 : vector<16x16xf32>
    %31 = arith.addf %25, %30 : vector<16x16xf32>
    %c0_23 = arith.constant 0 : index
    %c1_24 = arith.constant 1 : index
    %32 = vector.load %arg6[%c0_23, %c1_24] : memref<22x22xf32, #tpu.memory_space<vmem>>, vector<16x16xf32>
    %33 = vector.broadcast %27 : f32 to vector<16x16xf32>
    %34 = arith.mulf %33, %32 : vector<16x16xf32>
    %35 = arith.addf %31, %34 : vector<16x16xf32>
    %c2 = arith.constant 2 : index
    %36 = memref.load %arg2[%c2] : memref<98xf32, #tpu.memory_space<smem>>
    %c51 = arith.constant 51 : index
    %37 = memref.load %arg2[%c51] : memref<98xf32, #tpu.memory_space<smem>>
    %c0_25 = arith.constant 0 : index
    %c2_26 = arith.constant 2 : index
    %38 = vector.load %arg5[%c0_25, %c2_26] : memref<22x22xf32, #tpu.memory_space<vmem>>, vector<16x16xf32>
    %39 = vector.broadcast %36 : f32 to vector<16x16xf32>
    %40 = arith.mulf %39, %38 : vector<16x16xf32>
    %41 = arith.addf %35, %40 : vector<16x16xf32>
    %c0_27 = arith.constant 0 : index
    %c2_28 = arith.constant 2 : index
    %42 = vector.load %arg6[%c0_27, %c2_28] : memref<22x22xf32, #tpu.memory_space<vmem>>, vector<16x16xf32>
    %43 = vector.broadcast %37 : f32 to vector<16x16xf32>
    %44 = arith.mulf %43, %42 : vector<16x16xf32>
    %45 = arith.addf %41, %44 : vector<16x16xf32>
    %c3_29 = arith.constant 3 : index
    %46 = memref.load %arg2[%c3_29] : memref<98xf32, #tpu.memory_space<smem>>
    %c52 = arith.constant 52 : index
    %47 = memref.load %arg2[%c52] : memref<98xf32, #tpu.memory_space<smem>>
    %c0_30 = arith.constant 0 : index
    %c3_31 = arith.constant 3 : index
    %48 = vector.load %arg5[%c0_30, %c3_31] : memref<22x22xf32, #tpu.memory_space<vmem>>, vector<16x16xf32>
    %49 = vector.broadcast %46 : f32 to vector<16x16xf32>
    %50 = arith.mulf %49, %48 : vector<16x16xf32>
    %51 = arith.addf %45, %50 : vector<16x16xf32>
    %c0_32 = arith.constant 0 : index
    %c3_33 = arith.constant 3 : index
    %52 = vector.load %arg6[%c0_32, %c3_33] : memref<22x22xf32, #tpu.memory_space<vmem>>, vector<16x16xf32>
    %53 = vector.broadcast %47 : f32 to vector<16x16xf32>
    %54 = arith.mulf %53, %52 : vector<16x16xf32>
    %55 = arith.addf %51, %54 : vector<16x16xf32>
    %c4 = arith.constant 4 : index
    %56 = memref.load %arg2[%c4] : memref<98xf32, #tpu.memory_space<smem>>
    %c53 = arith.constant 53 : index
    %57 = memref.load %arg2[%c53] : memref<98xf32, #tpu.memory_space<smem>>
    %c0_34 = arith.constant 0 : index
    %c4_35 = arith.constant 4 : index
    %58 = vector.load %arg5[%c0_34, %c4_35] : memref<22x22xf32, #tpu.memory_space<vmem>>, vector<16x16xf32>
    %59 = vector.broadcast %56 : f32 to vector<16x16xf32>
    %60 = arith.mulf %59, %58 : vector<16x16xf32>
    %61 = arith.addf %55, %60 : vector<16x16xf32>
    %c0_36 = arith.constant 0 : index
    %c4_37 = arith.constant 4 : index
    %62 = vector.load %arg6[%c0_36, %c4_37] : memref<22x22xf32, #tpu.memory_space<vmem>>, vector<16x16xf32>
    %63 = vector.broadcast %57 : f32 to vector<16x16xf32>
    %64 = arith.mulf %63, %62 : vector<16x16xf32>
    %65 = arith.addf %61, %64 : vector<16x16xf32>
    %c5 = arith.constant 5 : index
    %66 = memref.load %arg2[%c5] : memref<98xf32, #tpu.memory_space<smem>>
    %c54 = arith.constant 54 : index
    %67 = memref.load %arg2[%c54] : memref<98xf32, #tpu.memory_space<smem>>
    %c0_38 = arith.constant 0 : index
    %c5_39 = arith.constant 5 : index
    %68 = vector.load %arg5[%c0_38, %c5_39] : memref<22x22xf32, #tpu.memory_space<vmem>>, vector<16x16xf32>
    %69 = vector.broadcast %66 : f32 to vector<16x16xf32>
    %70 = arith.mulf %69, %68 : vector<16x16xf32>
    %71 = arith.addf %65, %70 : vector<16x16xf32>
    %c0_40 = arith.constant 0 : index
    %c5_41 = arith.constant 5 : index
    %72 = vector.load %arg6[%c0_40, %c5_41] : memref<22x22xf32, #tpu.memory_space<vmem>>, vector<16x16xf32>
    %73 = vector.broadcast %67 : f32 to vector<16x16xf32>
    %74 = arith.mulf %73, %72 : vector<16x16xf32>
    %75 = arith.addf %71, %74 : vector<16x16xf32>
    %c6 = arith.constant 6 : index
    %76 = memref.load %arg2[%c6] : memref<98xf32, #tpu.memory_space<smem>>
    %c55 = arith.constant 55 : index
    %77 = memref.load %arg2[%c55] : memref<98xf32, #tpu.memory_space<smem>>
    %c0_42 = arith.constant 0 : index
    %c6_43 = arith.constant 6 : index
    %78 = vector.load %arg5[%c0_42, %c6_43] : memref<22x22xf32, #tpu.memory_space<vmem>>, vector<16x16xf32>
    %79 = vector.broadcast %76 : f32 to vector<16x16xf32>
    %80 = arith.mulf %79, %78 : vector<16x16xf32>
    %81 = arith.addf %75, %80 : vector<16x16xf32>
    %c0_44 = arith.constant 0 : index
    %c6_45 = arith.constant 6 : index
    %82 = vector.load %arg6[%c0_44, %c6_45] : memref<22x22xf32, #tpu.memory_space<vmem>>, vector<16x16xf32>
    %83 = vector.broadcast %77 : f32 to vector<16x16xf32>
    %84 = arith.mulf %83, %82 : vector<16x16xf32>
    %85 = arith.addf %81, %84 : vector<16x16xf32>
    %c7 = arith.constant 7 : index
    %86 = memref.load %arg2[%c7] : memref<98xf32, #tpu.memory_space<smem>>
    %c56 = arith.constant 56 : index
    %87 = memref.load %arg2[%c56] : memref<98xf32, #tpu.memory_space<smem>>
    %c1_46 = arith.constant 1 : index
    %c0_47 = arith.constant 0 : index
    %88 = vector.load %arg5[%c1_46, %c0_47] : memref<22x22xf32, #tpu.memory_space<vmem>>, vector<16x16xf32>
    %89 = vector.broadcast %86 : f32 to vector<16x16xf32>
    %90 = arith.mulf %89, %88 : vector<16x16xf32>
    %91 = arith.addf %85, %90 : vector<16x16xf32>
    %c1_48 = arith.constant 1 : index
    %c0_49 = arith.constant 0 : index
    %92 = vector.load %arg6[%c1_48, %c0_49] : memref<22x22xf32, #tpu.memory_space<vmem>>, vector<16x16xf32>
    %93 = vector.broadcast %87 : f32 to vector<16x16xf32>
    %94 = arith.mulf %93, %92 : vector<16x16xf32>
    %95 = arith.addf %91, %94 : vector<16x16xf32>
    %c8 = arith.constant 8 : index
    %96 = memref.load %arg2[%c8] : memref<98xf32, #tpu.memory_space<smem>>
    %c57 = arith.constant 57 : index
    %97 = memref.load %arg2[%c57] : memref<98xf32, #tpu.memory_space<smem>>
    %c1_50 = arith.constant 1 : index
    %c1_51 = arith.constant 1 : index
    %98 = vector.load %arg5[%c1_50, %c1_51] : memref<22x22xf32, #tpu.memory_space<vmem>>, vector<16x16xf32>
    %99 = vector.broadcast %96 : f32 to vector<16x16xf32>
    %100 = arith.mulf %99, %98 : vector<16x16xf32>
    %101 = arith.addf %95, %100 : vector<16x16xf32>
    %c1_52 = arith.constant 1 : index
    %c1_53 = arith.constant 1 : index
    %102 = vector.load %arg6[%c1_52, %c1_53] : memref<22x22xf32, #tpu.memory_space<vmem>>, vector<16x16xf32>
    %103 = vector.broadcast %97 : f32 to vector<16x16xf32>
    %104 = arith.mulf %103, %102 : vector<16x16xf32>
    %105 = arith.addf %101, %104 : vector<16x16xf32>
    %c9 = arith.constant 9 : index
    %106 = memref.load %arg2[%c9] : memref<98xf32, #tpu.memory_space<smem>>
    %c58 = arith.constant 58 : index
    %107 = memref.load %arg2[%c58] : memref<98xf32, #tpu.memory_space<smem>>
    %c1_54 = arith.constant 1 : index
    %c2_55 = arith.constant 2 : index
    %108 = vector.load %arg5[%c1_54, %c2_55] : memref<22x22xf32, #tpu.memory_space<vmem>>, vector<16x16xf32>
    %109 = vector.broadcast %106 : f32 to vector<16x16xf32>
    %110 = arith.mulf %109, %108 : vector<16x16xf32>
    %111 = arith.addf %105, %110 : vector<16x16xf32>
    %c1_56 = arith.constant 1 : index
    %c2_57 = arith.constant 2 : index
    %112 = vector.load %arg6[%c1_56, %c2_57] : memref<22x22xf32, #tpu.memory_space<vmem>>, vector<16x16xf32>
    %113 = vector.broadcast %107 : f32 to vector<16x16xf32>
    %114 = arith.mulf %113, %112 : vector<16x16xf32>
    %115 = arith.addf %111, %114 : vector<16x16xf32>
    %c10 = arith.constant 10 : index
    %116 = memref.load %arg2[%c10] : memref<98xf32, #tpu.memory_space<smem>>
    %c59 = arith.constant 59 : index
    %117 = memref.load %arg2[%c59] : memref<98xf32, #tpu.memory_space<smem>>
    %c1_58 = arith.constant 1 : index
    %c3_59 = arith.constant 3 : index
    %118 = vector.load %arg5[%c1_58, %c3_59] : memref<22x22xf32, #tpu.memory_space<vmem>>, vector<16x16xf32>
    %119 = vector.broadcast %116 : f32 to vector<16x16xf32>
    %120 = arith.mulf %119, %118 : vector<16x16xf32>
    %121 = arith.addf %115, %120 : vector<16x16xf32>
    %c1_60 = arith.constant 1 : index
    %c3_61 = arith.constant 3 : index
    %122 = vector.load %arg6[%c1_60, %c3_61] : memref<22x22xf32, #tpu.memory_space<vmem>>, vector<16x16xf32>
    %123 = vector.broadcast %117 : f32 to vector<16x16xf32>
    %124 = arith.mulf %123, %122 : vector<16x16xf32>
    %125 = arith.addf %121, %124 : vector<16x16xf32>
    %c11 = arith.constant 11 : index
    %126 = memref.load %arg2[%c11] : memref<98xf32, #tpu.memory_space<smem>>
    %c60 = arith.constant 60 : index
    %127 = memref.load %arg2[%c60] : memref<98xf32, #tpu.memory_space<smem>>
    %c1_62 = arith.constant 1 : index
    %c4_63 = arith.constant 4 : index
    %128 = vector.load %arg5[%c1_62, %c4_63] : memref<22x22xf32, #tpu.memory_space<vmem>>, vector<16x16xf32>
    %129 = vector.broadcast %126 : f32 to vector<16x16xf32>
    %130 = arith.mulf %129, %128 : vector<16x16xf32>
    %131 = arith.addf %125, %130 : vector<16x16xf32>
    %c1_64 = arith.constant 1 : index
    %c4_65 = arith.constant 4 : index
    %132 = vector.load %arg6[%c1_64, %c4_65] : memref<22x22xf32, #tpu.memory_space<vmem>>, vector<16x16xf32>
    %133 = vector.broadcast %127 : f32 to vector<16x16xf32>
    %134 = arith.mulf %133, %132 : vector<16x16xf32>
    %135 = arith.addf %131, %134 : vector<16x16xf32>
    %c12 = arith.constant 12 : index
    %136 = memref.load %arg2[%c12] : memref<98xf32, #tpu.memory_space<smem>>
    %c61 = arith.constant 61 : index
    %137 = memref.load %arg2[%c61] : memref<98xf32, #tpu.memory_space<smem>>
    %c1_66 = arith.constant 1 : index
    %c5_67 = arith.constant 5 : index
    %138 = vector.load %arg5[%c1_66, %c5_67] : memref<22x22xf32, #tpu.memory_space<vmem>>, vector<16x16xf32>
    %139 = vector.broadcast %136 : f32 to vector<16x16xf32>
    %140 = arith.mulf %139, %138 : vector<16x16xf32>
    %141 = arith.addf %135, %140 : vector<16x16xf32>
    %c1_68 = arith.constant 1 : index
    %c5_69 = arith.constant 5 : index
    %142 = vector.load %arg6[%c1_68, %c5_69] : memref<22x22xf32, #tpu.memory_space<vmem>>, vector<16x16xf32>
    %143 = vector.broadcast %137 : f32 to vector<16x16xf32>
    %144 = arith.mulf %143, %142 : vector<16x16xf32>
    %145 = arith.addf %141, %144 : vector<16x16xf32>
    %c13 = arith.constant 13 : index
    %146 = memref.load %arg2[%c13] : memref<98xf32, #tpu.memory_space<smem>>
    %c62 = arith.constant 62 : index
    %147 = memref.load %arg2[%c62] : memref<98xf32, #tpu.memory_space<smem>>
    %c1_70 = arith.constant 1 : index
    %c6_71 = arith.constant 6 : index
    %148 = vector.load %arg5[%c1_70, %c6_71] : memref<22x22xf32, #tpu.memory_space<vmem>>, vector<16x16xf32>
    %149 = vector.broadcast %146 : f32 to vector<16x16xf32>
    %150 = arith.mulf %149, %148 : vector<16x16xf32>
    %151 = arith.addf %145, %150 : vector<16x16xf32>
    %c1_72 = arith.constant 1 : index
    %c6_73 = arith.constant 6 : index
    %152 = vector.load %arg6[%c1_72, %c6_73] : memref<22x22xf32, #tpu.memory_space<vmem>>, vector<16x16xf32>
    %153 = vector.broadcast %147 : f32 to vector<16x16xf32>
    %154 = arith.mulf %153, %152 : vector<16x16xf32>
    %155 = arith.addf %151, %154 : vector<16x16xf32>
    %c14 = arith.constant 14 : index
    %156 = memref.load %arg2[%c14] : memref<98xf32, #tpu.memory_space<smem>>
    %c63 = arith.constant 63 : index
    %157 = memref.load %arg2[%c63] : memref<98xf32, #tpu.memory_space<smem>>
    %c2_74 = arith.constant 2 : index
    %c0_75 = arith.constant 0 : index
    %158 = vector.load %arg5[%c2_74, %c0_75] : memref<22x22xf32, #tpu.memory_space<vmem>>, vector<16x16xf32>
    %159 = vector.broadcast %156 : f32 to vector<16x16xf32>
    %160 = arith.mulf %159, %158 : vector<16x16xf32>
    %161 = arith.addf %155, %160 : vector<16x16xf32>
    %c2_76 = arith.constant 2 : index
    %c0_77 = arith.constant 0 : index
    %162 = vector.load %arg6[%c2_76, %c0_77] : memref<22x22xf32, #tpu.memory_space<vmem>>, vector<16x16xf32>
    %163 = vector.broadcast %157 : f32 to vector<16x16xf32>
    %164 = arith.mulf %163, %162 : vector<16x16xf32>
    %165 = arith.addf %161, %164 : vector<16x16xf32>
    %c15 = arith.constant 15 : index
    %166 = memref.load %arg2[%c15] : memref<98xf32, #tpu.memory_space<smem>>
    %c64 = arith.constant 64 : index
    %167 = memref.load %arg2[%c64] : memref<98xf32, #tpu.memory_space<smem>>
    %c2_78 = arith.constant 2 : index
    %c1_79 = arith.constant 1 : index
    %168 = vector.load %arg5[%c2_78, %c1_79] : memref<22x22xf32, #tpu.memory_space<vmem>>, vector<16x16xf32>
    %169 = vector.broadcast %166 : f32 to vector<16x16xf32>
    %170 = arith.mulf %169, %168 : vector<16x16xf32>
    %171 = arith.addf %165, %170 : vector<16x16xf32>
    %c2_80 = arith.constant 2 : index
    %c1_81 = arith.constant 1 : index
    %172 = vector.load %arg6[%c2_80, %c1_81] : memref<22x22xf32, #tpu.memory_space<vmem>>, vector<16x16xf32>
    %173 = vector.broadcast %167 : f32 to vector<16x16xf32>
    %174 = arith.mulf %173, %172 : vector<16x16xf32>
    %175 = arith.addf %171, %174 : vector<16x16xf32>
    %c16 = arith.constant 16 : index
    %176 = memref.load %arg2[%c16] : memref<98xf32, #tpu.memory_space<smem>>
    %c65 = arith.constant 65 : index
    %177 = memref.load %arg2[%c65] : memref<98xf32, #tpu.memory_space<smem>>
    %c2_82 = arith.constant 2 : index
    %c2_83 = arith.constant 2 : index
    %178 = vector.load %arg5[%c2_82, %c2_83] : memref<22x22xf32, #tpu.memory_space<vmem>>, vector<16x16xf32>
    %179 = vector.broadcast %176 : f32 to vector<16x16xf32>
    %180 = arith.mulf %179, %178 : vector<16x16xf32>
    %181 = arith.addf %175, %180 : vector<16x16xf32>
    %c2_84 = arith.constant 2 : index
    %c2_85 = arith.constant 2 : index
    %182 = vector.load %arg6[%c2_84, %c2_85] : memref<22x22xf32, #tpu.memory_space<vmem>>, vector<16x16xf32>
    %183 = vector.broadcast %177 : f32 to vector<16x16xf32>
    %184 = arith.mulf %183, %182 : vector<16x16xf32>
    %185 = arith.addf %181, %184 : vector<16x16xf32>
    %c17 = arith.constant 17 : index
    %186 = memref.load %arg2[%c17] : memref<98xf32, #tpu.memory_space<smem>>
    %c66 = arith.constant 66 : index
    %187 = memref.load %arg2[%c66] : memref<98xf32, #tpu.memory_space<smem>>
    %c2_86 = arith.constant 2 : index
    %c3_87 = arith.constant 3 : index
    %188 = vector.load %arg5[%c2_86, %c3_87] : memref<22x22xf32, #tpu.memory_space<vmem>>, vector<16x16xf32>
    %189 = vector.broadcast %186 : f32 to vector<16x16xf32>
    %190 = arith.mulf %189, %188 : vector<16x16xf32>
    %191 = arith.addf %185, %190 : vector<16x16xf32>
    %c2_88 = arith.constant 2 : index
    %c3_89 = arith.constant 3 : index
    %192 = vector.load %arg6[%c2_88, %c3_89] : memref<22x22xf32, #tpu.memory_space<vmem>>, vector<16x16xf32>
    %193 = vector.broadcast %187 : f32 to vector<16x16xf32>
    %194 = arith.mulf %193, %192 : vector<16x16xf32>
    %195 = arith.addf %191, %194 : vector<16x16xf32>
    %c18 = arith.constant 18 : index
    %196 = memref.load %arg2[%c18] : memref<98xf32, #tpu.memory_space<smem>>
    %c67 = arith.constant 67 : index
    %197 = memref.load %arg2[%c67] : memref<98xf32, #tpu.memory_space<smem>>
    %c2_90 = arith.constant 2 : index
    %c4_91 = arith.constant 4 : index
    %198 = vector.load %arg5[%c2_90, %c4_91] : memref<22x22xf32, #tpu.memory_space<vmem>>, vector<16x16xf32>
    %199 = vector.broadcast %196 : f32 to vector<16x16xf32>
    %200 = arith.mulf %199, %198 : vector<16x16xf32>
    %201 = arith.addf %195, %200 : vector<16x16xf32>
    %c2_92 = arith.constant 2 : index
    %c4_93 = arith.constant 4 : index
    %202 = vector.load %arg6[%c2_92, %c4_93] : memref<22x22xf32, #tpu.memory_space<vmem>>, vector<16x16xf32>
    %203 = vector.broadcast %197 : f32 to vector<16x16xf32>
    %204 = arith.mulf %203, %202 : vector<16x16xf32>
    %205 = arith.addf %201, %204 : vector<16x16xf32>
    %c19 = arith.constant 19 : index
    %206 = memref.load %arg2[%c19] : memref<98xf32, #tpu.memory_space<smem>>
    %c68 = arith.constant 68 : index
    %207 = memref.load %arg2[%c68] : memref<98xf32, #tpu.memory_space<smem>>
    %c2_94 = arith.constant 2 : index
    %c5_95 = arith.constant 5 : index
    %208 = vector.load %arg5[%c2_94, %c5_95] : memref<22x22xf32, #tpu.memory_space<vmem>>, vector<16x16xf32>
    %209 = vector.broadcast %206 : f32 to vector<16x16xf32>
    %210 = arith.mulf %209, %208 : vector<16x16xf32>
    %211 = arith.addf %205, %210 : vector<16x16xf32>
    %c2_96 = arith.constant 2 : index
    %c5_97 = arith.constant 5 : index
    %212 = vector.load %arg6[%c2_96, %c5_97] : memref<22x22xf32, #tpu.memory_space<vmem>>, vector<16x16xf32>
    %213 = vector.broadcast %207 : f32 to vector<16x16xf32>
    %214 = arith.mulf %213, %212 : vector<16x16xf32>
    %215 = arith.addf %211, %214 : vector<16x16xf32>
    %c20 = arith.constant 20 : index
    %216 = memref.load %arg2[%c20] : memref<98xf32, #tpu.memory_space<smem>>
    %c69 = arith.constant 69 : index
    %217 = memref.load %arg2[%c69] : memref<98xf32, #tpu.memory_space<smem>>
    %c2_98 = arith.constant 2 : index
    %c6_99 = arith.constant 6 : index
    %218 = vector.load %arg5[%c2_98, %c6_99] : memref<22x22xf32, #tpu.memory_space<vmem>>, vector<16x16xf32>
    %219 = vector.broadcast %216 : f32 to vector<16x16xf32>
    %220 = arith.mulf %219, %218 : vector<16x16xf32>
    %221 = arith.addf %215, %220 : vector<16x16xf32>
    %c2_100 = arith.constant 2 : index
    %c6_101 = arith.constant 6 : index
    %222 = vector.load %arg6[%c2_100, %c6_101] : memref<22x22xf32, #tpu.memory_space<vmem>>, vector<16x16xf32>
    %223 = vector.broadcast %217 : f32 to vector<16x16xf32>
    %224 = arith.mulf %223, %222 : vector<16x16xf32>
    %225 = arith.addf %221, %224 : vector<16x16xf32>
    %c21 = arith.constant 21 : index
    %226 = memref.load %arg2[%c21] : memref<98xf32, #tpu.memory_space<smem>>
    %c70 = arith.constant 70 : index
    %227 = memref.load %arg2[%c70] : memref<98xf32, #tpu.memory_space<smem>>
    %c3_102 = arith.constant 3 : index
    %c0_103 = arith.constant 0 : index
    %228 = vector.load %arg5[%c3_102, %c0_103] : memref<22x22xf32, #tpu.memory_space<vmem>>, vector<16x16xf32>
    %229 = vector.broadcast %226 : f32 to vector<16x16xf32>
    %230 = arith.mulf %229, %228 : vector<16x16xf32>
    %231 = arith.addf %225, %230 : vector<16x16xf32>
    %c3_104 = arith.constant 3 : index
    %c0_105 = arith.constant 0 : index
    %232 = vector.load %arg6[%c3_104, %c0_105] : memref<22x22xf32, #tpu.memory_space<vmem>>, vector<16x16xf32>
    %233 = vector.broadcast %227 : f32 to vector<16x16xf32>
    %234 = arith.mulf %233, %232 : vector<16x16xf32>
    %235 = arith.addf %231, %234 : vector<16x16xf32>
    %c22 = arith.constant 22 : index
    %236 = memref.load %arg2[%c22] : memref<98xf32, #tpu.memory_space<smem>>
    %c71 = arith.constant 71 : index
    %237 = memref.load %arg2[%c71] : memref<98xf32, #tpu.memory_space<smem>>
    %c3_106 = arith.constant 3 : index
    %c1_107 = arith.constant 1 : index
    %238 = vector.load %arg5[%c3_106, %c1_107] : memref<22x22xf32, #tpu.memory_space<vmem>>, vector<16x16xf32>
    %239 = vector.broadcast %236 : f32 to vector<16x16xf32>
    %240 = arith.mulf %239, %238 : vector<16x16xf32>
    %241 = arith.addf %235, %240 : vector<16x16xf32>
    %c3_108 = arith.constant 3 : index
    %c1_109 = arith.constant 1 : index
    %242 = vector.load %arg6[%c3_108, %c1_109] : memref<22x22xf32, #tpu.memory_space<vmem>>, vector<16x16xf32>
    %243 = vector.broadcast %237 : f32 to vector<16x16xf32>
    %244 = arith.mulf %243, %242 : vector<16x16xf32>
    %245 = arith.addf %241, %244 : vector<16x16xf32>
    %c23 = arith.constant 23 : index
    %246 = memref.load %arg2[%c23] : memref<98xf32, #tpu.memory_space<smem>>
    %c72 = arith.constant 72 : index
    %247 = memref.load %arg2[%c72] : memref<98xf32, #tpu.memory_space<smem>>
    %c3_110 = arith.constant 3 : index
    %c2_111 = arith.constant 2 : index
    %248 = vector.load %arg5[%c3_110, %c2_111] : memref<22x22xf32, #tpu.memory_space<vmem>>, vector<16x16xf32>
    %249 = vector.broadcast %246 : f32 to vector<16x16xf32>
    %250 = arith.mulf %249, %248 : vector<16x16xf32>
    %251 = arith.addf %245, %250 : vector<16x16xf32>
    %c3_112 = arith.constant 3 : index
    %c2_113 = arith.constant 2 : index
    %252 = vector.load %arg6[%c3_112, %c2_113] : memref<22x22xf32, #tpu.memory_space<vmem>>, vector<16x16xf32>
    %253 = vector.broadcast %247 : f32 to vector<16x16xf32>
    %254 = arith.mulf %253, %252 : vector<16x16xf32>
    %255 = arith.addf %251, %254 : vector<16x16xf32>
    %c24 = arith.constant 24 : index
    %256 = memref.load %arg2[%c24] : memref<98xf32, #tpu.memory_space<smem>>
    %c73 = arith.constant 73 : index
    %257 = memref.load %arg2[%c73] : memref<98xf32, #tpu.memory_space<smem>>
    %c3_114 = arith.constant 3 : index
    %c3_115 = arith.constant 3 : index
    %258 = vector.load %arg5[%c3_114, %c3_115] : memref<22x22xf32, #tpu.memory_space<vmem>>, vector<16x16xf32>
    %259 = vector.broadcast %256 : f32 to vector<16x16xf32>
    %260 = arith.mulf %259, %258 : vector<16x16xf32>
    %261 = arith.addf %255, %260 : vector<16x16xf32>
    %c3_116 = arith.constant 3 : index
    %c3_117 = arith.constant 3 : index
    %262 = vector.load %arg6[%c3_116, %c3_117] : memref<22x22xf32, #tpu.memory_space<vmem>>, vector<16x16xf32>
    %263 = vector.broadcast %257 : f32 to vector<16x16xf32>
    %264 = arith.mulf %263, %262 : vector<16x16xf32>
    %265 = arith.addf %261, %264 : vector<16x16xf32>
    %c25 = arith.constant 25 : index
    %266 = memref.load %arg2[%c25] : memref<98xf32, #tpu.memory_space<smem>>
    %c74 = arith.constant 74 : index
    %267 = memref.load %arg2[%c74] : memref<98xf32, #tpu.memory_space<smem>>
    %c3_118 = arith.constant 3 : index
    %c4_119 = arith.constant 4 : index
    %268 = vector.load %arg5[%c3_118, %c4_119] : memref<22x22xf32, #tpu.memory_space<vmem>>, vector<16x16xf32>
    %269 = vector.broadcast %266 : f32 to vector<16x16xf32>
    %270 = arith.mulf %269, %268 : vector<16x16xf32>
    %271 = arith.addf %265, %270 : vector<16x16xf32>
    %c3_120 = arith.constant 3 : index
    %c4_121 = arith.constant 4 : index
    %272 = vector.load %arg6[%c3_120, %c4_121] : memref<22x22xf32, #tpu.memory_space<vmem>>, vector<16x16xf32>
    %273 = vector.broadcast %267 : f32 to vector<16x16xf32>
    %274 = arith.mulf %273, %272 : vector<16x16xf32>
    %275 = arith.addf %271, %274 : vector<16x16xf32>
    %c26 = arith.constant 26 : index
    %276 = memref.load %arg2[%c26] : memref<98xf32, #tpu.memory_space<smem>>
    %c75 = arith.constant 75 : index
    %277 = memref.load %arg2[%c75] : memref<98xf32, #tpu.memory_space<smem>>
    %c3_122 = arith.constant 3 : index
    %c5_123 = arith.constant 5 : index
    %278 = vector.load %arg5[%c3_122, %c5_123] : memref<22x22xf32, #tpu.memory_space<vmem>>, vector<16x16xf32>
    %279 = vector.broadcast %276 : f32 to vector<16x16xf32>
    %280 = arith.mulf %279, %278 : vector<16x16xf32>
    %281 = arith.addf %275, %280 : vector<16x16xf32>
    %c3_124 = arith.constant 3 : index
    %c5_125 = arith.constant 5 : index
    %282 = vector.load %arg6[%c3_124, %c5_125] : memref<22x22xf32, #tpu.memory_space<vmem>>, vector<16x16xf32>
    %283 = vector.broadcast %277 : f32 to vector<16x16xf32>
    %284 = arith.mulf %283, %282 : vector<16x16xf32>
    %285 = arith.addf %281, %284 : vector<16x16xf32>
    %c27 = arith.constant 27 : index
    %286 = memref.load %arg2[%c27] : memref<98xf32, #tpu.memory_space<smem>>
    %c76 = arith.constant 76 : index
    %287 = memref.load %arg2[%c76] : memref<98xf32, #tpu.memory_space<smem>>
    %c3_126 = arith.constant 3 : index
    %c6_127 = arith.constant 6 : index
    %288 = vector.load %arg5[%c3_126, %c6_127] : memref<22x22xf32, #tpu.memory_space<vmem>>, vector<16x16xf32>
    %289 = vector.broadcast %286 : f32 to vector<16x16xf32>
    %290 = arith.mulf %289, %288 : vector<16x16xf32>
    %291 = arith.addf %285, %290 : vector<16x16xf32>
    %c3_128 = arith.constant 3 : index
    %c6_129 = arith.constant 6 : index
    %292 = vector.load %arg6[%c3_128, %c6_129] : memref<22x22xf32, #tpu.memory_space<vmem>>, vector<16x16xf32>
    %293 = vector.broadcast %287 : f32 to vector<16x16xf32>
    %294 = arith.mulf %293, %292 : vector<16x16xf32>
    %295 = arith.addf %291, %294 : vector<16x16xf32>
    %c28 = arith.constant 28 : index
    %296 = memref.load %arg2[%c28] : memref<98xf32, #tpu.memory_space<smem>>
    %c77 = arith.constant 77 : index
    %297 = memref.load %arg2[%c77] : memref<98xf32, #tpu.memory_space<smem>>
    %c4_130 = arith.constant 4 : index
    %c0_131 = arith.constant 0 : index
    %298 = vector.load %arg5[%c4_130, %c0_131] : memref<22x22xf32, #tpu.memory_space<vmem>>, vector<16x16xf32>
    %299 = vector.broadcast %296 : f32 to vector<16x16xf32>
    %300 = arith.mulf %299, %298 : vector<16x16xf32>
    %301 = arith.addf %295, %300 : vector<16x16xf32>
    %c4_132 = arith.constant 4 : index
    %c0_133 = arith.constant 0 : index
    %302 = vector.load %arg6[%c4_132, %c0_133] : memref<22x22xf32, #tpu.memory_space<vmem>>, vector<16x16xf32>
    %303 = vector.broadcast %297 : f32 to vector<16x16xf32>
    %304 = arith.mulf %303, %302 : vector<16x16xf32>
    %305 = arith.addf %301, %304 : vector<16x16xf32>
    %c29 = arith.constant 29 : index
    %306 = memref.load %arg2[%c29] : memref<98xf32, #tpu.memory_space<smem>>
    %c78 = arith.constant 78 : index
    %307 = memref.load %arg2[%c78] : memref<98xf32, #tpu.memory_space<smem>>
    %c4_134 = arith.constant 4 : index
    %c1_135 = arith.constant 1 : index
    %308 = vector.load %arg5[%c4_134, %c1_135] : memref<22x22xf32, #tpu.memory_space<vmem>>, vector<16x16xf32>
    %309 = vector.broadcast %306 : f32 to vector<16x16xf32>
    %310 = arith.mulf %309, %308 : vector<16x16xf32>
    %311 = arith.addf %305, %310 : vector<16x16xf32>
    %c4_136 = arith.constant 4 : index
    %c1_137 = arith.constant 1 : index
    %312 = vector.load %arg6[%c4_136, %c1_137] : memref<22x22xf32, #tpu.memory_space<vmem>>, vector<16x16xf32>
    %313 = vector.broadcast %307 : f32 to vector<16x16xf32>
    %314 = arith.mulf %313, %312 : vector<16x16xf32>
    %315 = arith.addf %311, %314 : vector<16x16xf32>
    %c30 = arith.constant 30 : index
    %316 = memref.load %arg2[%c30] : memref<98xf32, #tpu.memory_space<smem>>
    %c79 = arith.constant 79 : index
    %317 = memref.load %arg2[%c79] : memref<98xf32, #tpu.memory_space<smem>>
    %c4_138 = arith.constant 4 : index
    %c2_139 = arith.constant 2 : index
    %318 = vector.load %arg5[%c4_138, %c2_139] : memref<22x22xf32, #tpu.memory_space<vmem>>, vector<16x16xf32>
    %319 = vector.broadcast %316 : f32 to vector<16x16xf32>
    %320 = arith.mulf %319, %318 : vector<16x16xf32>
    %321 = arith.addf %315, %320 : vector<16x16xf32>
    %c4_140 = arith.constant 4 : index
    %c2_141 = arith.constant 2 : index
    %322 = vector.load %arg6[%c4_140, %c2_141] : memref<22x22xf32, #tpu.memory_space<vmem>>, vector<16x16xf32>
    %323 = vector.broadcast %317 : f32 to vector<16x16xf32>
    %324 = arith.mulf %323, %322 : vector<16x16xf32>
    %325 = arith.addf %321, %324 : vector<16x16xf32>
    %c31 = arith.constant 31 : index
    %326 = memref.load %arg2[%c31] : memref<98xf32, #tpu.memory_space<smem>>
    %c80 = arith.constant 80 : index
    %327 = memref.load %arg2[%c80] : memref<98xf32, #tpu.memory_space<smem>>
    %c4_142 = arith.constant 4 : index
    %c3_143 = arith.constant 3 : index
    %328 = vector.load %arg5[%c4_142, %c3_143] : memref<22x22xf32, #tpu.memory_space<vmem>>, vector<16x16xf32>
    %329 = vector.broadcast %326 : f32 to vector<16x16xf32>
    %330 = arith.mulf %329, %328 : vector<16x16xf32>
    %331 = arith.addf %325, %330 : vector<16x16xf32>
    %c4_144 = arith.constant 4 : index
    %c3_145 = arith.constant 3 : index
    %332 = vector.load %arg6[%c4_144, %c3_145] : memref<22x22xf32, #tpu.memory_space<vmem>>, vector<16x16xf32>
    %333 = vector.broadcast %327 : f32 to vector<16x16xf32>
    %334 = arith.mulf %333, %332 : vector<16x16xf32>
    %335 = arith.addf %331, %334 : vector<16x16xf32>
    %c32 = arith.constant 32 : index
    %336 = memref.load %arg2[%c32] : memref<98xf32, #tpu.memory_space<smem>>
    %c81 = arith.constant 81 : index
    %337 = memref.load %arg2[%c81] : memref<98xf32, #tpu.memory_space<smem>>
    %c4_146 = arith.constant 4 : index
    %c4_147 = arith.constant 4 : index
    %338 = vector.load %arg5[%c4_146, %c4_147] : memref<22x22xf32, #tpu.memory_space<vmem>>, vector<16x16xf32>
    %339 = vector.broadcast %336 : f32 to vector<16x16xf32>
    %340 = arith.mulf %339, %338 : vector<16x16xf32>
    %341 = arith.addf %335, %340 : vector<16x16xf32>
    %c4_148 = arith.constant 4 : index
    %c4_149 = arith.constant 4 : index
    %342 = vector.load %arg6[%c4_148, %c4_149] : memref<22x22xf32, #tpu.memory_space<vmem>>, vector<16x16xf32>
    %343 = vector.broadcast %337 : f32 to vector<16x16xf32>
    %344 = arith.mulf %343, %342 : vector<16x16xf32>
    %345 = arith.addf %341, %344 : vector<16x16xf32>
    %c33 = arith.constant 33 : index
    %346 = memref.load %arg2[%c33] : memref<98xf32, #tpu.memory_space<smem>>
    %c82 = arith.constant 82 : index
    %347 = memref.load %arg2[%c82] : memref<98xf32, #tpu.memory_space<smem>>
    %c4_150 = arith.constant 4 : index
    %c5_151 = arith.constant 5 : index
    %348 = vector.load %arg5[%c4_150, %c5_151] : memref<22x22xf32, #tpu.memory_space<vmem>>, vector<16x16xf32>
    %349 = vector.broadcast %346 : f32 to vector<16x16xf32>
    %350 = arith.mulf %349, %348 : vector<16x16xf32>
    %351 = arith.addf %345, %350 : vector<16x16xf32>
    %c4_152 = arith.constant 4 : index
    %c5_153 = arith.constant 5 : index
    %352 = vector.load %arg6[%c4_152, %c5_153] : memref<22x22xf32, #tpu.memory_space<vmem>>, vector<16x16xf32>
    %353 = vector.broadcast %347 : f32 to vector<16x16xf32>
    %354 = arith.mulf %353, %352 : vector<16x16xf32>
    %355 = arith.addf %351, %354 : vector<16x16xf32>
    %c34 = arith.constant 34 : index
    %356 = memref.load %arg2[%c34] : memref<98xf32, #tpu.memory_space<smem>>
    %c83 = arith.constant 83 : index
    %357 = memref.load %arg2[%c83] : memref<98xf32, #tpu.memory_space<smem>>
    %c4_154 = arith.constant 4 : index
    %c6_155 = arith.constant 6 : index
    %358 = vector.load %arg5[%c4_154, %c6_155] : memref<22x22xf32, #tpu.memory_space<vmem>>, vector<16x16xf32>
    %359 = vector.broadcast %356 : f32 to vector<16x16xf32>
    %360 = arith.mulf %359, %358 : vector<16x16xf32>
    %361 = arith.addf %355, %360 : vector<16x16xf32>
    %c4_156 = arith.constant 4 : index
    %c6_157 = arith.constant 6 : index
    %362 = vector.load %arg6[%c4_156, %c6_157] : memref<22x22xf32, #tpu.memory_space<vmem>>, vector<16x16xf32>
    %363 = vector.broadcast %357 : f32 to vector<16x16xf32>
    %364 = arith.mulf %363, %362 : vector<16x16xf32>
    %365 = arith.addf %361, %364 : vector<16x16xf32>
    %c35 = arith.constant 35 : index
    %366 = memref.load %arg2[%c35] : memref<98xf32, #tpu.memory_space<smem>>
    %c84 = arith.constant 84 : index
    %367 = memref.load %arg2[%c84] : memref<98xf32, #tpu.memory_space<smem>>
    %c5_158 = arith.constant 5 : index
    %c0_159 = arith.constant 0 : index
    %368 = vector.load %arg5[%c5_158, %c0_159] : memref<22x22xf32, #tpu.memory_space<vmem>>, vector<16x16xf32>
    %369 = vector.broadcast %366 : f32 to vector<16x16xf32>
    %370 = arith.mulf %369, %368 : vector<16x16xf32>
    %371 = arith.addf %365, %370 : vector<16x16xf32>
    %c5_160 = arith.constant 5 : index
    %c0_161 = arith.constant 0 : index
    %372 = vector.load %arg6[%c5_160, %c0_161] : memref<22x22xf32, #tpu.memory_space<vmem>>, vector<16x16xf32>
    %373 = vector.broadcast %367 : f32 to vector<16x16xf32>
    %374 = arith.mulf %373, %372 : vector<16x16xf32>
    %375 = arith.addf %371, %374 : vector<16x16xf32>
    %c36 = arith.constant 36 : index
    %376 = memref.load %arg2[%c36] : memref<98xf32, #tpu.memory_space<smem>>
    %c85 = arith.constant 85 : index
    %377 = memref.load %arg2[%c85] : memref<98xf32, #tpu.memory_space<smem>>
    %c5_162 = arith.constant 5 : index
    %c1_163 = arith.constant 1 : index
    %378 = vector.load %arg5[%c5_162, %c1_163] : memref<22x22xf32, #tpu.memory_space<vmem>>, vector<16x16xf32>
    %379 = vector.broadcast %376 : f32 to vector<16x16xf32>
    %380 = arith.mulf %379, %378 : vector<16x16xf32>
    %381 = arith.addf %375, %380 : vector<16x16xf32>
    %c5_164 = arith.constant 5 : index
    %c1_165 = arith.constant 1 : index
    %382 = vector.load %arg6[%c5_164, %c1_165] : memref<22x22xf32, #tpu.memory_space<vmem>>, vector<16x16xf32>
    %383 = vector.broadcast %377 : f32 to vector<16x16xf32>
    %384 = arith.mulf %383, %382 : vector<16x16xf32>
    %385 = arith.addf %381, %384 : vector<16x16xf32>
    %c37 = arith.constant 37 : index
    %386 = memref.load %arg2[%c37] : memref<98xf32, #tpu.memory_space<smem>>
    %c86 = arith.constant 86 : index
    %387 = memref.load %arg2[%c86] : memref<98xf32, #tpu.memory_space<smem>>
    %c5_166 = arith.constant 5 : index
    %c2_167 = arith.constant 2 : index
    %388 = vector.load %arg5[%c5_166, %c2_167] : memref<22x22xf32, #tpu.memory_space<vmem>>, vector<16x16xf32>
    %389 = vector.broadcast %386 : f32 to vector<16x16xf32>
    %390 = arith.mulf %389, %388 : vector<16x16xf32>
    %391 = arith.addf %385, %390 : vector<16x16xf32>
    %c5_168 = arith.constant 5 : index
    %c2_169 = arith.constant 2 : index
    %392 = vector.load %arg6[%c5_168, %c2_169] : memref<22x22xf32, #tpu.memory_space<vmem>>, vector<16x16xf32>
    %393 = vector.broadcast %387 : f32 to vector<16x16xf32>
    %394 = arith.mulf %393, %392 : vector<16x16xf32>
    %395 = arith.addf %391, %394 : vector<16x16xf32>
    %c38 = arith.constant 38 : index
    %396 = memref.load %arg2[%c38] : memref<98xf32, #tpu.memory_space<smem>>
    %c87 = arith.constant 87 : index
    %397 = memref.load %arg2[%c87] : memref<98xf32, #tpu.memory_space<smem>>
    %c5_170 = arith.constant 5 : index
    %c3_171 = arith.constant 3 : index
    %398 = vector.load %arg5[%c5_170, %c3_171] : memref<22x22xf32, #tpu.memory_space<vmem>>, vector<16x16xf32>
    %399 = vector.broadcast %396 : f32 to vector<16x16xf32>
    %400 = arith.mulf %399, %398 : vector<16x16xf32>
    %401 = arith.addf %395, %400 : vector<16x16xf32>
    %c5_172 = arith.constant 5 : index
    %c3_173 = arith.constant 3 : index
    %402 = vector.load %arg6[%c5_172, %c3_173] : memref<22x22xf32, #tpu.memory_space<vmem>>, vector<16x16xf32>
    %403 = vector.broadcast %397 : f32 to vector<16x16xf32>
    %404 = arith.mulf %403, %402 : vector<16x16xf32>
    %405 = arith.addf %401, %404 : vector<16x16xf32>
    %c39 = arith.constant 39 : index
    %406 = memref.load %arg2[%c39] : memref<98xf32, #tpu.memory_space<smem>>
    %c88 = arith.constant 88 : index
    %407 = memref.load %arg2[%c88] : memref<98xf32, #tpu.memory_space<smem>>
    %c5_174 = arith.constant 5 : index
    %c4_175 = arith.constant 4 : index
    %408 = vector.load %arg5[%c5_174, %c4_175] : memref<22x22xf32, #tpu.memory_space<vmem>>, vector<16x16xf32>
    %409 = vector.broadcast %406 : f32 to vector<16x16xf32>
    %410 = arith.mulf %409, %408 : vector<16x16xf32>
    %411 = arith.addf %405, %410 : vector<16x16xf32>
    %c5_176 = arith.constant 5 : index
    %c4_177 = arith.constant 4 : index
    %412 = vector.load %arg6[%c5_176, %c4_177] : memref<22x22xf32, #tpu.memory_space<vmem>>, vector<16x16xf32>
    %413 = vector.broadcast %407 : f32 to vector<16x16xf32>
    %414 = arith.mulf %413, %412 : vector<16x16xf32>
    %415 = arith.addf %411, %414 : vector<16x16xf32>
    %c40 = arith.constant 40 : index
    %416 = memref.load %arg2[%c40] : memref<98xf32, #tpu.memory_space<smem>>
    %c89 = arith.constant 89 : index
    %417 = memref.load %arg2[%c89] : memref<98xf32, #tpu.memory_space<smem>>
    %c5_178 = arith.constant 5 : index
    %c5_179 = arith.constant 5 : index
    %418 = vector.load %arg5[%c5_178, %c5_179] : memref<22x22xf32, #tpu.memory_space<vmem>>, vector<16x16xf32>
    %419 = vector.broadcast %416 : f32 to vector<16x16xf32>
    %420 = arith.mulf %419, %418 : vector<16x16xf32>
    %421 = arith.addf %415, %420 : vector<16x16xf32>
    %c5_180 = arith.constant 5 : index
    %c5_181 = arith.constant 5 : index
    %422 = vector.load %arg6[%c5_180, %c5_181] : memref<22x22xf32, #tpu.memory_space<vmem>>, vector<16x16xf32>
    %423 = vector.broadcast %417 : f32 to vector<16x16xf32>
    %424 = arith.mulf %423, %422 : vector<16x16xf32>
    %425 = arith.addf %421, %424 : vector<16x16xf32>
    %c41 = arith.constant 41 : index
    %426 = memref.load %arg2[%c41] : memref<98xf32, #tpu.memory_space<smem>>
    %c90 = arith.constant 90 : index
    %427 = memref.load %arg2[%c90] : memref<98xf32, #tpu.memory_space<smem>>
    %c5_182 = arith.constant 5 : index
    %c6_183 = arith.constant 6 : index
    %428 = vector.load %arg5[%c5_182, %c6_183] : memref<22x22xf32, #tpu.memory_space<vmem>>, vector<16x16xf32>
    %429 = vector.broadcast %426 : f32 to vector<16x16xf32>
    %430 = arith.mulf %429, %428 : vector<16x16xf32>
    %431 = arith.addf %425, %430 : vector<16x16xf32>
    %c5_184 = arith.constant 5 : index
    %c6_185 = arith.constant 6 : index
    %432 = vector.load %arg6[%c5_184, %c6_185] : memref<22x22xf32, #tpu.memory_space<vmem>>, vector<16x16xf32>
    %433 = vector.broadcast %427 : f32 to vector<16x16xf32>
    %434 = arith.mulf %433, %432 : vector<16x16xf32>
    %435 = arith.addf %431, %434 : vector<16x16xf32>
    %c42 = arith.constant 42 : index
    %436 = memref.load %arg2[%c42] : memref<98xf32, #tpu.memory_space<smem>>
    %c91 = arith.constant 91 : index
    %437 = memref.load %arg2[%c91] : memref<98xf32, #tpu.memory_space<smem>>
    %c6_186 = arith.constant 6 : index
    %c0_187 = arith.constant 0 : index
    %438 = vector.load %arg5[%c6_186, %c0_187] : memref<22x22xf32, #tpu.memory_space<vmem>>, vector<16x16xf32>
    %439 = vector.broadcast %436 : f32 to vector<16x16xf32>
    %440 = arith.mulf %439, %438 : vector<16x16xf32>
    %441 = arith.addf %435, %440 : vector<16x16xf32>
    %c6_188 = arith.constant 6 : index
    %c0_189 = arith.constant 0 : index
    %442 = vector.load %arg6[%c6_188, %c0_189] : memref<22x22xf32, #tpu.memory_space<vmem>>, vector<16x16xf32>
    %443 = vector.broadcast %437 : f32 to vector<16x16xf32>
    %444 = arith.mulf %443, %442 : vector<16x16xf32>
    %445 = arith.addf %441, %444 : vector<16x16xf32>
    %c43 = arith.constant 43 : index
    %446 = memref.load %arg2[%c43] : memref<98xf32, #tpu.memory_space<smem>>
    %c92 = arith.constant 92 : index
    %447 = memref.load %arg2[%c92] : memref<98xf32, #tpu.memory_space<smem>>
    %c6_190 = arith.constant 6 : index
    %c1_191 = arith.constant 1 : index
    %448 = vector.load %arg5[%c6_190, %c1_191] : memref<22x22xf32, #tpu.memory_space<vmem>>, vector<16x16xf32>
    %449 = vector.broadcast %446 : f32 to vector<16x16xf32>
    %450 = arith.mulf %449, %448 : vector<16x16xf32>
    %451 = arith.addf %445, %450 : vector<16x16xf32>
    %c6_192 = arith.constant 6 : index
    %c1_193 = arith.constant 1 : index
    %452 = vector.load %arg6[%c6_192, %c1_193] : memref<22x22xf32, #tpu.memory_space<vmem>>, vector<16x16xf32>
    %453 = vector.broadcast %447 : f32 to vector<16x16xf32>
    %454 = arith.mulf %453, %452 : vector<16x16xf32>
    %455 = arith.addf %451, %454 : vector<16x16xf32>
    %c44 = arith.constant 44 : index
    %456 = memref.load %arg2[%c44] : memref<98xf32, #tpu.memory_space<smem>>
    %c93 = arith.constant 93 : index
    %457 = memref.load %arg2[%c93] : memref<98xf32, #tpu.memory_space<smem>>
    %c6_194 = arith.constant 6 : index
    %c2_195 = arith.constant 2 : index
    %458 = vector.load %arg5[%c6_194, %c2_195] : memref<22x22xf32, #tpu.memory_space<vmem>>, vector<16x16xf32>
    %459 = vector.broadcast %456 : f32 to vector<16x16xf32>
    %460 = arith.mulf %459, %458 : vector<16x16xf32>
    %461 = arith.addf %455, %460 : vector<16x16xf32>
    %c6_196 = arith.constant 6 : index
    %c2_197 = arith.constant 2 : index
    %462 = vector.load %arg6[%c6_196, %c2_197] : memref<22x22xf32, #tpu.memory_space<vmem>>, vector<16x16xf32>
    %463 = vector.broadcast %457 : f32 to vector<16x16xf32>
    %464 = arith.mulf %463, %462 : vector<16x16xf32>
    %465 = arith.addf %461, %464 : vector<16x16xf32>
    %c45 = arith.constant 45 : index
    %466 = memref.load %arg2[%c45] : memref<98xf32, #tpu.memory_space<smem>>
    %c94 = arith.constant 94 : index
    %467 = memref.load %arg2[%c94] : memref<98xf32, #tpu.memory_space<smem>>
    %c6_198 = arith.constant 6 : index
    %c3_199 = arith.constant 3 : index
    %468 = vector.load %arg5[%c6_198, %c3_199] : memref<22x22xf32, #tpu.memory_space<vmem>>, vector<16x16xf32>
    %469 = vector.broadcast %466 : f32 to vector<16x16xf32>
    %470 = arith.mulf %469, %468 : vector<16x16xf32>
    %471 = arith.addf %465, %470 : vector<16x16xf32>
    %c6_200 = arith.constant 6 : index
    %c3_201 = arith.constant 3 : index
    %472 = vector.load %arg6[%c6_200, %c3_201] : memref<22x22xf32, #tpu.memory_space<vmem>>, vector<16x16xf32>
    %473 = vector.broadcast %467 : f32 to vector<16x16xf32>
    %474 = arith.mulf %473, %472 : vector<16x16xf32>
    %475 = arith.addf %471, %474 : vector<16x16xf32>
    %c46 = arith.constant 46 : index
    %476 = memref.load %arg2[%c46] : memref<98xf32, #tpu.memory_space<smem>>
    %c95 = arith.constant 95 : index
    %477 = memref.load %arg2[%c95] : memref<98xf32, #tpu.memory_space<smem>>
    %c6_202 = arith.constant 6 : index
    %c4_203 = arith.constant 4 : index
    %478 = vector.load %arg5[%c6_202, %c4_203] : memref<22x22xf32, #tpu.memory_space<vmem>>, vector<16x16xf32>
    %479 = vector.broadcast %476 : f32 to vector<16x16xf32>
    %480 = arith.mulf %479, %478 : vector<16x16xf32>
    %481 = arith.addf %475, %480 : vector<16x16xf32>
    %c6_204 = arith.constant 6 : index
    %c4_205 = arith.constant 4 : index
    %482 = vector.load %arg6[%c6_204, %c4_205] : memref<22x22xf32, #tpu.memory_space<vmem>>, vector<16x16xf32>
    %483 = vector.broadcast %477 : f32 to vector<16x16xf32>
    %484 = arith.mulf %483, %482 : vector<16x16xf32>
    %485 = arith.addf %481, %484 : vector<16x16xf32>
    %c47 = arith.constant 47 : index
    %486 = memref.load %arg2[%c47] : memref<98xf32, #tpu.memory_space<smem>>
    %c96 = arith.constant 96 : index
    %487 = memref.load %arg2[%c96] : memref<98xf32, #tpu.memory_space<smem>>
    %c6_206 = arith.constant 6 : index
    %c5_207 = arith.constant 5 : index
    %488 = vector.load %arg5[%c6_206, %c5_207] : memref<22x22xf32, #tpu.memory_space<vmem>>, vector<16x16xf32>
    %489 = vector.broadcast %486 : f32 to vector<16x16xf32>
    %490 = arith.mulf %489, %488 : vector<16x16xf32>
    %491 = arith.addf %485, %490 : vector<16x16xf32>
    %c6_208 = arith.constant 6 : index
    %c5_209 = arith.constant 5 : index
    %492 = vector.load %arg6[%c6_208, %c5_209] : memref<22x22xf32, #tpu.memory_space<vmem>>, vector<16x16xf32>
    %493 = vector.broadcast %487 : f32 to vector<16x16xf32>
    %494 = arith.mulf %493, %492 : vector<16x16xf32>
    %495 = arith.addf %491, %494 : vector<16x16xf32>
    %c48 = arith.constant 48 : index
    %496 = memref.load %arg2[%c48] : memref<98xf32, #tpu.memory_space<smem>>
    %c97 = arith.constant 97 : index
    %497 = memref.load %arg2[%c97] : memref<98xf32, #tpu.memory_space<smem>>
    %c6_210 = arith.constant 6 : index
    %c6_211 = arith.constant 6 : index
    %498 = vector.load %arg5[%c6_210, %c6_211] : memref<22x22xf32, #tpu.memory_space<vmem>>, vector<16x16xf32>
    %499 = vector.broadcast %496 : f32 to vector<16x16xf32>
    %500 = arith.mulf %499, %498 : vector<16x16xf32>
    %501 = arith.addf %495, %500 : vector<16x16xf32>
    %c6_212 = arith.constant 6 : index
    %c6_213 = arith.constant 6 : index
    %502 = vector.load %arg6[%c6_212, %c6_213] : memref<22x22xf32, #tpu.memory_space<vmem>>, vector<16x16xf32>
    %503 = vector.broadcast %497 : f32 to vector<16x16xf32>
    %504 = arith.mulf %503, %502 : vector<16x16xf32>
    %505 = arith.addf %501, %504 : vector<16x16xf32>
    %cst_214 = arith.constant 0.000000e+00 : f32
    %506 = vector.broadcast %cst_214 : f32 to vector<16x16xf32>
    %507 = arith.subf %506, %505 : vector<16x16xf32>
    %508 = math.exp %507 : vector<16x16xf32>
    %cst_215 = arith.constant 1.000000e+00 : f32
    %509 = vector.broadcast %cst_215 : f32 to vector<16x16xf32>
    %510 = arith.addf %509, %508 : vector<16x16xf32>
    %cst_216 = arith.constant 1.000000e+00 : f32
    %511 = vector.broadcast %cst_216 : f32 to vector<16x16xf32>
    %512 = arith.divf %511, %510 : vector<16x16xf32>
    %513 = vector.shape_cast %512 : vector<16x16xf32> to vector<1x16x16xf32>
    %514 = vector.broadcast %513 : vector<1x16x16xf32> to vector<4x16x16xf32>
    %515 = arith.mulf %1, %514 : vector<4x16x16xf32>
    %c0_217 = arith.constant 0 : index
    %c0_218 = arith.constant 0 : index
    %c0_219 = arith.constant 0 : index
    %c0_220 = arith.constant 0 : index
    %516 = vector.load %arg4[%c0_217, %c0_218, %c0_219, %c0_220] : memref<1x4x16x16xf32, #tpu.memory_space<vmem>>, vector<1x4x16x16xf32>
    %517 = vector.shape_cast %516 : vector<1x4x16x16xf32> to vector<4x16x16xf32>
    %518 = vector.shape_cast %515 : vector<4x16x16xf32> to vector<1x4x16x16xf32>
    tpu.vector_store %arg4[%c0_217, %c0_218, %c0_219, %c0_220], %518 {strides = array<i32>} : memref<1x4x16x16xf32, #tpu.memory_space<vmem>>, vector<1x4x16x16xf32>,
    return
  }
  func.func @transform_0(%arg0: i32) -> (i32, i32, i32, i32) {
    %c0_i32 = arith.constant 0 : i32
    %c0_i32_0 = arith.constant 0 : i32
    %c0_i32_1 = arith.constant 0 : i32
    %c0_i32_2 = arith.constant 0 : i32
    return %arg0, %c0_i32, %c0_i32_0, %c0_i32_1 : i32, i32, i32, i32
  }
  func.func @transform_1(%arg0: i32) -> i32 {
    %c0_i32 = arith.constant 0 : i32
    %c0_i32_0 = arith.constant 0 : i32
    return %c0_i32 : i32
  }
  func.func @transform_2(%arg0: i32) -> i32 {
    %c0_i32 = arith.constant 0 : i32
    %c0_i32_0 = arith.constant 0 : i32
    return %c0_i32 : i32
  }
  func.func @transform_3(%arg0: i32) -> (i32, i32, i32, i32) {
    %c0_i32 = arith.constant 0 : i32
    %c0_i32_0 = arith.constant 0 : i32
    %c0_i32_1 = arith.constant 0 : i32
    %c0_i32_2 = arith.constant 0 : i32
    return %arg0, %c0_i32, %c0_i32_0, %c0_i32_1 : i32, i32, i32, i32
  }
}

</mosaic_0001>

<bundles_post_ra>
// kernel: tpu_custom_call.1
= control target key start
LH: loop header
LB: loop body
LE: loop exit
PB: predicated region body
PF: predicated region fallthrough
CT: control target
= control target key end

     0   :  { %s2939_s0 = inlined_call_operand.hbm [shape: f32[2,4,16,16], index: 0, kind: input, shape index: {}]   ;;  %s2940_s1 = inlined_call_operand.vmem [shape: f32[98], index: 1, kind: input, shape index: {}]   ;;  %s2941_s2 = inlined_call_operand.<no memory space> [shape: f32[1], index: 2, kind: input, shape index: {}]   ;;  %s2942_s3 = inlined_call_operand.hbm [shape: f32[2,4,16,16], index: 3, kind: output, shape index: {}]  }
   0x1   :  { %8 = sst [smem:[#allocation4]] %s2941_s2 }
   0x2   :  { %9 = vsyncpa [#allocation6], 0 }
   0x3   :  { %11 = vsyncpa [#allocation6 + $0x1], 0 }
   0x4   :  { %12 = vsyncpa [#allocation8], 0 }
   0x5   :  { %13 = vsyncpa [#allocation7], 0 }
   0x6   :  { %15 = vsyncpa [#allocation7 + $0x1], 0  ;;  %s2046_s14 = smov 0   ;;  %s2048_s15 = smov 0  }
   0x7   :  { %s2050_s16 = smov 0   ;;  %s2052_s17 = smov 0  }
   0x8 LB: > { %s2067_s2 = sadd.s32 4294967295, %s2006_s17   ;;  %s1691_s18 = sadd.s32 4294967294, %s2006_s17   ;;  %s2006_s17 = sphi %s2052_s17, %s2962_s17   ;;  %s2002_s16 = sphi %s2050_s16, %s2961_s16   ;;  %s1998_s15 = sphi %s2048_s15, %s2960_s15   ;;  %s1994_s14 = sphi %s2046_s14, %s2959_s14  }
   0x9   : > { %s2071_s19 = sadd.s32 1, %s2006_s17   ;;  %s28_s20 = sadd.s32 1, %s2002_s16 }
   0xa   : > { %s25_s21 = ssub.s32 %s2006_s17, %s2071_s19  ;;  %p35_p0 = scmp.ne.s32.totalorder %s2002_s16, %s1998_s15 }
   0xb   : > { %p26_p1 = scmp.eq.s32.totalorder %s25_s21, 0  ;;  %p36_p2 = scmp.eq.s32.totalorder %s2006_s17, 0 }
   0xc   : > { %p41_p3 = scmp.ne.s32.totalorder %s1998_s15, %s1994_s14  ;;  %p2944_p4 = scmp.eq.s32.totalorder %s2067_s2, 0 }
   0xd   : > { %s2083_s22 = scalar_select %p26_p1, %s2002_s16, %s28_s20  }
   0xe   : > { %p2085_p5 = por %p36_p2, %p35_p0  ;;  %p2091_p6 = por %p2944_p4, %p41_p3 }
   0xf   : > { %p107_p7 = scmp.eq.s32.totalorder %s2067_s2, 1  ;;  %p113_p8 = scmp.eq.s32.totalorder %s1691_s18, 1 }
  0x10   : > { %s2947_s24 = scalar_select %p2091_p6, 1, 0 }
  0x11   : > { %p1692_p9 = scmp.ge.s32.totalorder %s2006_s17, 1  ;;  %p120_p10 = scmp.lt.s32.totalorder %s2006_s17, 3 }
  0x12   : > { %p2098_p11 = por %p107_p7, %p35_p0  ;;  %p2102_p12 = por %p113_p8, %p41_p3 }
  0x13   : > { %p2106_p13 = pnand %p1692_p9, %p120_p10  ;;  %s133_s30 = sshll.u32 %s2940_s1, 4  ;;  %s134_s30 = int_to_ptr.vmem [resolvable:$true] %s133_s30 }
  0x14   : > { %s2948_s25 = scalar_select %p2098_p11, 1, 0 }
  0x15   : > { %s2949_s26 = scalar_select %p2102_p12, 1, 0 }
  0x16   : > { %p1814_p1 = pneg %p2106_p13  ;;  %p1827_p2 = scmp.lt.s32.totalorder %s2006_s17, 2 }
  0x17   : > { %s147_s5 = sand.u32 1, %s2002_s16   ;;  %s1891_s8 = scalar_lea.vmem %s134_s30, 16 }
  0x18   : > { %p2119_p7 = pnand %p1814_p1, %p2944_p4  ;;  %p2126_p3 = pnand %p1827_p2, %p2085_p5 }
  0x19   : > { %s1695_s7 = sshll.u32 %s147_s5, 6  ;;  %p1892_p8 = scmp.ne.s32.totalorder %s134_s30, %s1891_s8 }
  0x1a   : > { %p1893_p9 = pneg %p2119_p7  ;;  %p1899_p12 = scmp.lt.s32.totalorder %s134_s30, %s134_s30 }
  0x1b   : > { %p1900_p11 = scmp.lt.s32.totalorder %s1891_s8, %s1891_s8 }
  0x1c   : > { %p1894_p10 = pnand %p1893_p9, %p1892_p8 }
  0x1d   : > { %p1901_p1 = por %p1900_p11, %p1899_p12 }
  0x1e   : > { %p1895_p0 = pneg %p1894_p10 }
  0x20   : > { %p1902_p4 = pnand %p1901_p1, %p1895_p0 }
  0x22   : > { %1905 = shalt.err (!%p1902_p4)
}
  0x23   : > { %s2008_s9 = smov [#allocation9]   ;;  %s1804_s10 = sshll.u32 %s2006_s17, 10 }
  0x24   : > { %1817 = dma.vmem_to_smem (!%p2119_p7), %s134_s30, 16, %s2008_s9, [#allocation8]  }
  0x25   : > { %s151_s11 = scalar_lea.vmem [#allocation5], %s1695_s7  ;;  %s2138_s20 = scalar_lea.hbm %s2939_s0, %s1804_s10 }
  0x26   : > { %s158_s12 = sshll.u32 %s151_s11, 4  ;;  %s2142_s21 = scalar_lea.sflag [#allocation6], %s147_s5  ;;  %s2140_s12 = int_to_ptr.vmem [resolvable:$true] %s158_s12 }
  0x27   : > { %s1906_s23 = scalar_lea.hbm %s2138_s20, 1024  ;;  %p1908_p5 = pneg %p2126_p3 }
  0x28   : > { %p1907_p4 = scmp.ne.s32.totalorder %s2138_s20, %s1906_s23  ;;  %s1911_s30 = scalar_lea.hbm %s2939_s0, 2048 }
  0x29   : > { %p1912_p0 = scmp.lt.u32.totalorder %s2138_s20, %s2939_s0  ;;  %p1913_p2 = scmp.lt.u32.totalorder %s1911_s30, %s1906_s23 }
  0x2a   : > { %p1909_p11 = pnand %p1908_p5, %p1907_p4  ;;  %p1915_p8 = scmp.lt.u32.totalorder %s1906_s23, %s2138_s20 }
  0x2b   : > { %p1914_p7 = por %p1913_p2, %p1912_p0 }
  0x2c   : > { %p1910_p12 = pneg %p1909_p11 }
  0x2d   : > { %p1916_p9 = por %p1915_p8, %p1914_p7 }
  0x2f   : > { %p1917_p10 = pnand %p1916_p9, %p1910_p12 }
  0x31   : > { %1920 = shalt.err (!%p1917_p10)
}
  0x32   : > { %s1921_s5 = scalar_lea.vmem %s2140_s12, 1024  ;;  %s2009_s8 = smov [#allocation5]  }
  0x33   : > { %p1922_p1 = scmp.ne.s32.totalorder %s2140_s12, %s1921_s5  ;;  %s1926_s9 = sshll.u32 %s2009_s8, 4  ;;  %s1927_s9 = int_to_ptr.vmem [resolvable:$false] %s1926_s9 }
  0x34   : > { %s1928_s10 = scalar_lea.vmem %s1927_s9, 2048  ;;  %p1929_p6 = scmp.lt.s32.totalorder %s2140_s12, %s1927_s9 }
  0x35   : > { %p1924_p4 = pnand %p1922_p1, %p1908_p5  ;;  %p1930_p0 = scmp.lt.s32.totalorder %s1928_s10, %s1921_s5 }
  0x37   : > { %p1925_p11 = pneg %p1924_p4  ;;  %p1931_p2 = por %p1930_p0, %p1929_p6 }
  0x39   : > { %p1932_p7 = pnand %p1931_p2, %p1925_p11 }
  0x3b   : > { %1935 = shalt.err (!%p1932_p7)
}
  0x3c   : > { %s2010_s11 = smov 128   ;;  %s2011_s13 = smov 8  }
  0x3d   : > { %1821 = dma.hbm_to_vmem [thread:$0]  (!%p2126_p3), %s2138_s20, 1024, %s2140_s12, %s2142_s21, %s2010_s11, %s2010_s11, %s2011_s13  }
  0x3e   : > { %170 = sbr.rel (%p2106_p13) target bundleno = 707 (0x2c3), region = 32  ;;  %s2173_s18 = sand.u32 (!%p2106_p13), 1, %s1998_s15  }
  0x3f   : > { %s1699_s23 = sshll.u32 (!%p2106_p13), %s2173_s18, 6  ;;  %s173_s28 = scalar_lea.sflag (!%p2106_p13), [#allocation6], %s2173_s18 }
  0x40   : > { %s2179_s29 = scalar_lea.vmem (!%p2106_p13), [#allocation5], %s1699_s23  ;;  %p2953_p6 = scmp.ne.s32.totalorder (!%p2106_p13), %s2947_s24, 0 }
  0x45   : > { %1981 = dma.done.wait (%p2953_p6), %s173_s28, 1024  }
  0x46   : > { %1983 = vsyncadd (%p2953_p6), %s173_s28, 4294966272  ;;  %p2954_p3 = scmp.eq.s32.totalorder %s2067_s2, 0 }
  0x48   : > { %1985 = dma.done.wait (%p2954_p3), [#allocation8], 16   ;;  %p2955_p13 = pmov %p2954_p3 }
  0x4a   : > { %1987 = vsyncadd (%p2955_p13), [#allocation8], 4294967280 }
  0x4b   : > { %185 = sfence }
  0x4c   : > { %v204_v0 = vld [vmem:[%s2179_s29] sm:$0xff]  ;;  %v206_v1 = vld [vmem:[%s2179_s29 + $0x10] sm:$0xff]  ;;  %vm212_vm0 = vcmask 130048   ;;  %v205_v7 = vld [vmem:[%s2179_s29 + $0x8] sm:$0xff]  ;;  %vm244_vm1 = vcmask 179200   ;;  %s2012_s24 = smov 3  }
  0x4d   : > { %v208_v2 = vld [vmem:[%s2179_s29 + $0x20] sm:$0xff]  ;;  %v210_v3 = vld [vmem:[%s2179_s29 + $0x30] sm:$0xff]  ;;  %v230_v4 = vsel %vm212_vm0, %v204_v0, -inf  ;;  %v231_v5 = vsel %vm212_vm0, %v206_v1, -inf  ;;  %v207_v8 = vld [vmem:[%s2179_s29 + $0x18] sm:$0xff]  ;;  %v237_v13 = vsel %vm212_vm0, %v205_v7, -inf }
  0x4e   : > { %v232_v6 = vsel %vm212_vm0, %v208_v2, -inf  ;;  %v234_v10 = vsel %vm212_vm0, %v210_v3, -inf  ;;  %v209_v11 = vld [vmem:[%s2179_s29 + $0x28] sm:$0xff]  ;;  %v211_v12 = vld [vmem:[%s2179_s29 + $0x38] sm:$0xff]  ;;  %v238_v14 = vsel %vm212_vm0, %v207_v8, -inf  ;;  %v213_v18 = vsel %vm212_vm0, %v204_v0, 0.0 }
  0x4f   : > { %v233_v9 = vmax.f32 %v230_v4, %v232_v6  ;;  %v235_v15 = vmax.f32 %v231_v5, %v234_v10  ;;  %v239_v16 = vsel %vm212_vm0, %v209_v11, -inf  ;;  %v241_v17 = vsel %vm212_vm0, %v211_v12, -inf  ;;  %s1704_s27 = sld [smem:[#allocation9 + $0x32]]  ;;  %s2214_s6 = sld [smem:[#allocation9 + $0x33]] }
  0x50   : > { %v240_v19 = vmax.f32 %v237_v13, %v239_v16  ;;  %v242_v20 = vmax.f32 %v238_v14, %v241_v17  ;;  %v214_v21 = vsel %vm212_vm0, %v206_v1, 0.0  ;;  %v216_v22 = vsel %vm212_vm0, %v208_v2, 0.0  ;;  %s2216_s12 = sld [smem:[#allocation9]]  ;;  %s2219_s20 = sld [smem:[#allocation9 + $0x31]] }
  0x51   : > { %v236_v23 = vmax.f32 %v233_v9, %v235_v15  ;;  %v215_v24 = vadd.f32 %v214_v21, %v213_v18  ;;  %v220_v25 = vsel %vm212_vm0, %v205_v7, 0.0  ;;  %v218_v26 = vsel %vm212_vm0, %v210_v3, 0.0  ;;  %s2221_s21 = sld [smem:[#allocation4]]  ;;  %s2224_s30 = sld [smem:[#allocation9 + $0x34]] }
  0x52   : > { %v221_v27 = vsel %vm212_vm0, %v207_v8, 0.0  ;;  %v223_v28 = vsel %vm212_vm0, %v209_v11, 0.0  ;;  %v243_v29 = vmax.f32 %v240_v19, %v242_v20  ;;  %v225_v32 = vsel %vm212_vm0, %v211_v12, 0.0  ;;  %s2014_s4 = smov 127   ;;  %s2229_s7 = sld [smem:[#allocation9 + $0x35]] }
  0x53   : > { %265 = vrot.lane.b32.xlu1 %v236_v23, %s2012_s24  ;;  %v217_v30 = vadd.f32 %v216_v22, %v215_v24  ;;  %v222_v31 = vadd.f32 %v221_v27, %v220_v25  ;;  %v2013_v33 = vmov 0.0   ;;  %vm247_vm2 = vcmask 177152   ;;  %s2015_s5 = smov 126   ;;  %s2240_s8 = sld [smem:[#allocation9 + $0x36]] }
  0x54   : > { %249 = vst.msk [vmem:[#allocation3] sm:$0xff] %vm244_vm1, %v2013_v33  ;;  %250 = vst.msk [vmem:[#allocation3 + $0x8] sm:$0xff] %vm244_vm1, %v2013_v33  ;;  %vm260_vm3 = vcmask 154648   ;;  %s1714_s9 = sld [smem:[#allocation9 + $0x37]]  ;;  %s2016_s10 = smov 125  }
  0x55   : > { %245 = vst.msk [vmem:[#allocation2] sm:$0xff] %vm244_vm1, %v2013_v33  ;;  %246 = vst.msk [vmem:[#allocation2 + $0x8] sm:$0xff] %vm244_vm1, %v2013_v33  ;;  %v219_v34 = vadd.f32 %v218_v26, %v217_v30  ;;  %v224_v35 = vadd.f32 %v223_v28, %v222_v31  ;;  %v307_v42 = vstv %s1704_s27  ;;  %v335_v46 = vstv %s2214_s6  ;;  %s1718_s11 = sld [smem:[#allocation9 + $0x39]]  ;;  %s2017_s13 = smov 124  }
  0x56   : > { %251 = vst.msk [vmem:[#allocation3 + $0x10] sm:$0x3f] %vm247_vm2, %v2013_v33  ;;  %248 = vst.msk [vmem:[#allocation2 + $0x10] sm:$0x3f] %vm247_vm2, %v2013_v33  ;;  %v280_v48 = vstv %s2216_s12  ;;  %v287_v51 = vstv %s2219_s20  ;;  %s1720_s28 = sld [smem:[#allocation9 + $0x3a]]  ;;  %s1722_s27 = sld [smem:[#allocation9 + $0x3b]] }
  0x57   : > { %267 = vrot.lane.b32.xlu1 %v243_v29, %s2012_s24  ;;  %v228_v36 = vmul.f32 0.25, %v219_v34  ;;  %v226_v37 = vadd.f32 %v225_v32, %v224_v35  ;;  %v274_v52 = vstv %s2221_s21  ;;  %v363_v55 = vstv %s2224_s30  ;;  %s2019_s6 = smov 122   ;;  %s1724_s12 = sld [smem:[#allocation9 + $0x3c]] }
  0x58   : > { %v391_v63 = vstv %s2229_s7  ;;  %s1726_s20 = sld [smem:[#allocation9 + $0x3d]]  ;;  %s1728_s21 = sld [smem:[#allocation9 + $0x3e]] }
  0x59   : > { %254 = vrot.lane.b32.xlu0 %v228_v36, %s2012_s24  ;;  %v229_v38 = vmul.f32 0.25, %v226_v37  ;;  %v419_v5 = vstv %s2240_s8  ;;  %s1732_s30 = sld [smem:[#allocation9 + $0x40]]  ;;  %s1734_s7 = sld [smem:[#allocation9 + $0x41]] }
  0x5a   : > { %v447_v8 = vstv %s1714_s9  ;;  %s1736_s8 = sld [smem:[#allocation9 + $0x42]]  ;;  %s1738_s9 = sld [smem:[#allocation9 + $0x43]] }
  0x5b   : > { %v491_v12 = vstv %s1718_s11  ;;  %s1703_s11 = sld [smem:[#allocation9 + $0x1]]  ;;  %p2956_p12 = scmp.ne.s32.totalorder %s2948_s25, 0 }
  0x5c   : > { %v519_v16 = vstv %s1720_s28  ;;  %v547_v19 = vstv %s1722_s27  ;;  %s1705_s28 = sld [smem:[#allocation9 + $0x2]]  ;;  %s1707_s27 = sld [smem:[#allocation9 + $0x3]] }
  0x5d   : > { %256 = vrot.lane.b32.xlu0 %v229_v38, %s2012_s24  ;;  %s2018_s24 = smov 123   ;;  %v575_v22 = vstv %s1724_s12  ;;  %s1709_s12 = sld [smem:[#allocation9 + $0x4]] }
  0x5e   : > { %v603_v25 = vstv %s1726_s20  ;;  %v631_v28 = vstv %s1728_s21  ;;  %s1711_s20 = sld [smem:[#allocation9 + $0x5]]  ;;  %s1713_s21 = sld [smem:[#allocation9 + $0x6]] }
  0x5f   : > { %v675_v32 = vstv %s1732_s30  ;;  %v703_v36 = vstv %s1734_s7  ;;  %s1717_s30 = sld [smem:[#allocation9 + $0x8]]  ;;  %s1719_s7 = sld [smem:[#allocation9 + $0x9]] }
  0xc5   : > { %v266_v39 = vpop.permute.xlu1 %265 }
  0xc6   : > { %271 = vst.msk [vmem:[#allocation3 + $0x3] sm:$0xff] %vm260_vm3, %v266_v39  ;;  %v731_v39 = vstv %s1736_s8  ;;  %s1721_s8 = sld [smem:[#allocation9 + $0xa]] }
  0xc9   : > { %v268_v40 = vpop.permute.xlu1 %267 }
  0xca   : > { %272 = vst.msk [vmem:[#allocation3 + $0xb] sm:$0xff] %vm260_vm3, %v268_v40 }
  0xcb   : > { %v255_v41 = vpop.permute.xlu0 %254 }
  0xcc   : > { %261 = vst.msk [vmem:[#allocation2 + $0x3] sm:$0xff] %vm260_vm3, %v255_v41 }
  0xcd   : > { %v285_v43 = vld [vmem:[#allocation3] sm:$0xff] }
  0xce   : > { %v308_v44 = vmul.f32 %v307_v42, %v285_v43  ;;  %v336_v50 = vmul.f32 %v335_v46, %v285_v43  ;;  %v288_v56 = vmul.f32 %v287_v51, %v285_v43  ;;  %v364_v60 = vmul.f32 %v363_v55, %v285_v43  ;;  %v2257_v11 = vld [vmem:[#allocation3 + $0x1] sm:$0xff] }
  0xcf   : > { %v257_v45 = vpop.permute.xlu0 %256  ;;  %v392_v3 = vmul.f32 %v391_v63, %v285_v43  ;;  %v420_v7 = vmul.f32 %v419_v5, %v285_v43  ;;  %v448_v10 = vmul.f32 %v447_v8, %v285_v43  ;;  %v492_v15 = vmul.f32 %v491_v12, %v2257_v11  ;;  %v2284_v31 = vld [vmem:[#allocation3 + $0x2] sm:$0xff] }
  0xd0   : > { %262 = vst.msk [vmem:[#allocation2 + $0xb] sm:$0xff] %vm260_vm3, %v257_v45  ;;  %312 = vrot.lane.b32.xlu0 %v308_v44, %s2014_s4  ;;  %v520_v18 = vmul.f32 %v519_v16, %v2257_v11  ;;  %v548_v21 = vmul.f32 %v547_v19, %v2257_v11  ;;  %v576_v24 = vmul.f32 %v575_v22, %v2257_v11  ;;  %v294_v44 = vstv %s1703_s11  ;;  %s1725_s11 = sld [smem:[#allocation9 + $0xc]] }
  0xd1   : > { %v286_v47 = vld [vmem:[#allocation3 + $0x8] sm:$0xff]  ;;  %v604_v27 = vmul.f32 %v603_v25, %v2257_v11  ;;  %v632_v30 = vmul.f32 %v631_v28, %v2257_v11  ;;  %v676_v35 = vmul.f32 %v675_v32, %v2284_v31  ;;  %v704_v38 = vmul.f32 %v703_v36, %v2284_v31 }
  0xd2   : > { %v309_v49 = vmul.f32 %v307_v42, %v286_v47  ;;  %v337_v58 = vmul.f32 %v335_v46, %v286_v47  ;;  %v289_v0 = vmul.f32 %v287_v51, %v286_v47  ;;  %v365_v2 = vmul.f32 %v363_v55, %v286_v47  ;;  %v2261_v14 = vld [vmem:[#allocation3 + $0x9] sm:$0xff] }
  0xd3   : > { %v2234_v53 = vld [vmem:[#allocation2] sm:$0xff]  ;;  %v393_v6 = vmul.f32 %v391_v63, %v286_v47  ;;  %v421_v9 = vmul.f32 %v419_v5, %v286_v47  ;;  %v449_v13 = vmul.f32 %v447_v8, %v286_v47  ;;  %v493_v17 = vmul.f32 %v491_v12, %v2261_v14 }
  0xd4   : > { %v281_v54 = vmul.f32 %v280_v48, %v2234_v53  ;;  %314 = vrot.lane.b32.xlu1 %v309_v49, %s2014_s4  ;;  %340 = vrot.lane.b32.xlu0 %v336_v50, %s2015_s5  ;;  %v521_v20 = vmul.f32 %v519_v16, %v2261_v14  ;;  %v549_v23 = vmul.f32 %v547_v19, %v2261_v14  ;;  %v2289_v34 = vld [vmem:[#allocation3 + $0xa] sm:$0xff]  ;;  %v759_v42 = vstv %s1738_s9  ;;  %s1723_s9 = sld [smem:[#allocation9 + $0xb]] }
  0xd5   : > { %v577_v26 = vmul.f32 %v575_v22, %v2261_v14  ;;  %v605_v29 = vmul.f32 %v603_v25, %v2261_v14  ;;  %v633_v33 = vmul.f32 %v631_v28, %v2261_v14  ;;  %v677_v37 = vmul.f32 %v675_v32, %v2289_v34 }
  0xd6   : > { %v283_v57 = vadd.f32 %v281_v54, %v274_v52  ;;  %v705_v40 = vmul.f32 %v703_v36, %v2289_v34  ;;  %v732_v41 = vmul.f32 %v731_v39, %v2284_v31  ;;  %v733_v43 = vmul.f32 %v731_v39, %v2289_v34 }
  0xd7   : > { %v2242_v59 = vld [vmem:[#allocation2 + $0x8] sm:$0xff]  ;;  %v760_v45 = vmul.f32 %v759_v42, %v2284_v31  ;;  %v295_v46 = vmul.f32 %v294_v44, %v2234_v53  ;;  %v761_v47 = vmul.f32 %v759_v42, %v2289_v34  ;;  %v350_v51 = vstv %s1707_s27  ;;  %s1731_s27 = sld [smem:[#allocation9 + $0xf]] }
  0xd8   : > { %v2244_v61 = vadd.f32 %v288_v56, %v283_v57  ;;  %v282_v62 = vmul.f32 %v280_v48, %v2242_v59  ;;  %342 = vrot.lane.b32.xlu1 %v337_v58, %s2015_s5  ;;  %368 = vrot.lane.b32.xlu0 %v364_v60, %s2016_s10  ;;  %v322_v48 = vstv %s1705_s28  ;;  %v296_v49 = vmul.f32 %v294_v44, %v2242_v59  ;;  %s1727_s28 = sld [smem:[#allocation9 + $0xd]] }
  0xd9   : > { %v323_v50 = vmul.f32 %v322_v48, %v2234_v53  ;;  %v351_v54 = vmul.f32 %v350_v51, %v2234_v53  ;;  %v378_v55 = vstv %s1709_s12  ;;  %v352_v56 = vmul.f32 %v350_v51, %v2242_v59  ;;  %s1733_s12 = sld [smem:[#allocation9 + $0x10]] }
  0xda   : > { %v284_v1 = vadd.f32 %v282_v62, %v274_v52  ;;  %v324_v52 = vmul.f32 %v322_v48, %v2242_v59  ;;  %v379_v57 = vmul.f32 %v378_v55, %v2234_v53  ;;  %v406_v58 = vstv %s1711_s20  ;;  %s1735_s20 = sld [smem:[#allocation9 + $0x11]] }
  0xdb   : > { %v380_v60 = vmul.f32 %v378_v55, %v2242_v59  ;;  %v407_v62 = vmul.f32 %v406_v58, %v2234_v53  ;;  %v434_v63 = vstv %s1713_s21  ;;  %v506_v8 = vstv %s1719_s7  ;;  %s1737_s21 = sld [smem:[#allocation9 + $0x12]]  ;;  %s1740_s7 = sld [smem:[#allocation9 + $0x44]] }
  0xdc   : > { %v2250_v4 = vadd.f32 %v289_v0, %v284_v1  ;;  %370 = vrot.lane.b32.xlu1 %v365_v2, %s2016_s10  ;;  %396 = vrot.lane.b32.xlu0 %v392_v3, %s2017_s13  ;;  %v408_v0 = vmul.f32 %v406_v58, %v2242_v59  ;;  %v435_v1 = vmul.f32 %v434_v63, %v2234_v53  ;;  %v2328_v2 = vld [vmem:[#allocation2 + $0x1] sm:$0xff]  ;;  %v478_v3 = vstv %s1717_s30  ;;  %s1739_s30 = sld [smem:[#allocation9 + $0x13]] }
  0xdd   : > { %v436_v5 = vmul.f32 %v434_v63, %v2242_v59 }
  0xdf   : > { %v690_v28 = vstv %s1733_s12  ;;  %s1748_s12 = sld [smem:[#allocation9 + $0x48]] }
  0xe0   : > { %398 = vrot.lane.b32.xlu1 %v393_v6, %s2017_s13  ;;  %424 = vrot.lane.b32.xlu0 %v420_v7, %s2018_s24  ;;  %v2333_v6 = vld [vmem:[#allocation2 + $0x9] sm:$0xff]  ;;  %v479_v7 = vmul.f32 %v478_v3, %v2328_v2 }
  0xe1   : > { %v480_v53 = vmul.f32 %v478_v3, %v2333_v6  ;;  %v508_v59 = vmul.f32 %v506_v8, %v2333_v6  ;;  %v746_v39 = vstv %s1737_s21  ;;  %s1750_s21 = sld [smem:[#allocation9 + $0x49]] }
  0xe2   : > { %v774_v44 = vstv %s1739_s30  ;;  %s1751_s30 = sld [smem:[#allocation9 + $0x19]] }
  0xe4   : > { %426 = vrot.lane.b32.xlu1 %v421_v9, %s2018_s24  ;;  %452 = vrot.lane.b32.xlu0 %v448_v10, %s2019_s6  ;;  %v507_v9 = vmul.f32 %v506_v8, %v2328_v2  ;;  %v534_v10 = vstv %s1721_s8  ;;  %s1741_s8 = sld [smem:[#allocation9 + $0x14]] }
  0xe5   : > { %v535_v12 = vmul.f32 %v534_v10, %v2328_v2 }
  0xe8   : > { %454 = vrot.lane.b32.xlu1 %v449_v13, %s2019_s6  ;;  %496 = vrot.lane.b32.xlu0 %v492_v15, %s2014_s4  ;;  %v562_v13 = vstv %s1723_s9  ;;  %v536_v15 = vmul.f32 %v534_v10, %v2333_v6  ;;  %s1742_s9 = sld [smem:[#allocation9 + $0x45]] }
  0xe9   : > { %v563_v16 = vmul.f32 %v562_v13, %v2328_v2 }
  0xea   : > { %v802_v55 = vstv %s1741_s8  ;;  %s1753_s8 = sld [smem:[#allocation9 + $0x1a]] }
  0xec   : > { %498 = vrot.lane.b32.xlu1 %v493_v17, %s2014_s4  ;;  %524 = vrot.lane.b32.xlu0 %v520_v18, %s2015_s5  ;;  %v590_v17 = vstv %s1725_s11  ;;  %v564_v18 = vmul.f32 %v562_v13, %v2333_v6  ;;  %s1745_s11 = sld [smem:[#allocation9 + $0x16]] }
  0xed   : > { %v591_v19 = vmul.f32 %v590_v17, %v2328_v2 }
  0xf0   : > { %526 = vrot.lane.b32.xlu1 %v521_v20, %s2015_s5  ;;  %552 = vrot.lane.b32.xlu0 %v548_v21, %s2016_s10  ;;  %v618_v20 = vstv %s1727_s28  ;;  %v592_v21 = vmul.f32 %v590_v17, %v2333_v6  ;;  %s2411_s28 = sld [smem:[#allocation9 + $0x47]] }
  0xf1   : > { %v619_v22 = vmul.f32 %v618_v20, %v2328_v2  ;;  %v620_v25 = vmul.f32 %v618_v20, %v2333_v6 }
  0xf4   : > { %554 = vrot.lane.b32.xlu1 %v549_v23, %s2016_s10  ;;  %580 = vrot.lane.b32.xlu0 %v576_v24, %s2017_s13  ;;  %v2356_v23 = vld [vmem:[#allocation2 + $0x2] sm:$0xff]  ;;  %v662_v24 = vstv %s1731_s27  ;;  %s1747_s27 = sld [smem:[#allocation9 + $0x17]] }
  0xf5   : > { %v691_v32 = vmul.f32 %v690_v28, %v2356_v23  ;;  %v775_v48 = vmul.f32 %v774_v44, %v2356_v23 }
  0xf6   : > { %v859_v13 = vstv %s2411_s28  ;;  %s2504_s28 = sld [smem:[#allocation9 + $0x4c]] }
  0xf8   : > { %582 = vrot.lane.b32.xlu1 %v577_v26, %s2017_s13  ;;  %608 = vrot.lane.b32.xlu0 %v604_v27, %s2018_s24  ;;  %v2361_v26 = vld [vmem:[#allocation2 + $0xa] sm:$0xff]  ;;  %v663_v27 = vmul.f32 %v662_v24, %v2356_v23 }
  0xf9   : > { %v776_v51 = vmul.f32 %v774_v44, %v2361_v26  ;;  %v915_v44 = vstv %s1750_s21  ;;  %s2540_s21 = sld [smem:[#allocation9 + $0x7]] }
  0xfa   : > { %v874_v20 = vstv %s1747_s27  ;;  %s2514_s27 = sld [smem:[#allocation9 + $0x1d]] }
  0xfc   : > { %610 = vrot.lane.b32.xlu1 %v605_v29, %s2018_s24  ;;  %636 = vrot.lane.b32.xlu0 %v632_v30, %s2019_s6  ;;  %v664_v30 = vmul.f32 %v662_v24, %v2361_v26 }
 0x100   : > { %638 = vrot.lane.b32.xlu1 %v633_v33, %s2019_s6  ;;  %680 = vrot.lane.b32.xlu0 %v676_v35, %s2014_s4  ;;  %v718_v33 = vstv %s1735_s20  ;;  %s1749_s20 = sld [smem:[#allocation9 + $0x18]] }
 0x104   : > { %682 = vrot.lane.b32.xlu1 %v677_v37, %s2014_s4  ;;  %708 = vrot.lane.b32.xlu0 %v704_v38, %s2015_s5  ;;  %v692_v37 = vmul.f32 %v690_v28, %v2361_v26  ;;  %v719_v38 = vmul.f32 %v718_v33, %v2356_v23 }
 0x108   : > { %710 = vrot.lane.b32.xlu1 %v705_v40, %s2015_s5  ;;  %736 = vrot.lane.b32.xlu0 %v732_v41, %s2016_s10  ;;  %v720_v41 = vmul.f32 %v718_v33, %v2361_v26 }
 0x10c   : > { %738 = vrot.lane.b32.xlu1 %v733_v43, %s2016_s10  ;;  %764 = vrot.lane.b32.xlu0 %v760_v45, %s2017_s13  ;;  %v747_v43 = vmul.f32 %v746_v39, %v2356_v23 }
 0x110   : > { %766 = vrot.lane.b32.xlu1 %v761_v47, %s2017_s13  ;;  %299 = vrot.lane.b32.xlu0 %v295_v46, %s2014_s4  ;;  %v748_v46 = vmul.f32 %v746_v39, %v2361_v26 }
 0x114   : > { %301 = vrot.lane.b32.xlu1 %v296_v49, %s2014_s4  ;;  %327 = vrot.lane.b32.xlu0 %v323_v50, %s2015_s5  ;;  %v787_v49 = vstv %s1740_s7  ;;  %s1752_s7 = sld [smem:[#allocation9 + $0x4a]] }
 0x118   : > { %329 = vrot.lane.b32.xlu1 %v324_v52, %s2015_s5  ;;  %355 = vrot.lane.b32.xlu0 %v351_v54, %s2016_s10  ;;  %v788_v54 = vmul.f32 %v787_v49, %v2284_v31 }
 0x11c   : > { %357 = vrot.lane.b32.xlu1 %v352_v56, %s2016_s10  ;;  %383 = vrot.lane.b32.xlu0 %v379_v57, %s2017_s13  ;;  %v789_v57 = vmul.f32 %v787_v49, %v2289_v34 }
 0x120   : > { %385 = vrot.lane.b32.xlu1 %v380_v60, %s2017_s13  ;;  %411 = vrot.lane.b32.xlu0 %v407_v62, %s2018_s24  ;;  %v803_v60 = vmul.f32 %v802_v55, %v2356_v23  ;;  %v815_v62 = vstv %s1742_s9  ;;  %s1754_s9 = sld [smem:[#allocation9 + $0x4b]] }
 0x121   : > { %v816_v3 = vmul.f32 %v815_v62, %v2284_v31 }
 0x124   : > { %413 = vrot.lane.b32.xlu1 %v408_v0, %s2018_s24  ;;  %439 = vrot.lane.b32.xlu0 %v435_v1, %s2019_s6  ;;  %v804_v0 = vmul.f32 %v802_v55, %v2361_v26 }
 0x128   : > { %441 = vrot.lane.b32.xlu1 %v436_v5, %s2019_s6  ;;  %483 = vrot.lane.b32.xlu0 %v479_v7, %s2014_s4  ;;  %v2420_v5 = vld [vmem:[#allocation2 + $0x3] sm:$0xff]  ;;  %v846_v7 = vstv %s1745_s11  ;;  %s2494_s11 = sld [smem:[#allocation9 + $0x1b]] }
 0x12c   : > { %485 = vrot.lane.b32.xlu1 %v480_v53, %s2014_s4  ;;  %511 = vrot.lane.b32.xlu0 %v507_v9, %s2015_s5  ;;  %v817_v53 = vmul.f32 %v815_v62, %v2289_v34  ;;  %v2427_v9 = vld [vmem:[#allocation2 + $0xb] sm:$0xff] }
 0x130   : > { %513 = vrot.lane.b32.xlu1 %v508_v59, %s2015_s5  ;;  %539 = vrot.lane.b32.xlu0 %v535_v12, %s2016_s10  ;;  %v847_v59 = vmul.f32 %v846_v7, %v2420_v5  ;;  %v2433_v12 = vld [vmem:[#allocation3 + $0x3] sm:$0xff] }
 0x134   : > { %541 = vrot.lane.b32.xlu1 %v536_v15, %s2016_s10  ;;  %567 = vrot.lane.b32.xlu0 %v563_v16, %s2017_s13  ;;  %v848_v16 = vmul.f32 %v846_v7, %v2427_v9 }
 0x138   : > { %569 = vrot.lane.b32.xlu1 %v564_v18, %s2017_s13  ;;  %595 = vrot.lane.b32.xlu0 %v591_v19, %s2018_s24  ;;  %v860_v18 = vmul.f32 %v859_v13, %v2433_v12  ;;  %v2443_v19 = vld [vmem:[#allocation3 + $0xb] sm:$0xff] }
 0x13c   : > { %597 = vrot.lane.b32.xlu1 %v592_v21, %s2018_s24  ;;  %623 = vrot.lane.b32.xlu0 %v619_v22, %s2019_s6  ;;  %v861_v22 = vmul.f32 %v859_v13, %v2443_v19  ;;  %v958_v13 = vstv %s1753_s8  ;;  %s2562_s8 = sld [smem:[#allocation9 + $0x1f]] }
 0x140   : > { %625 = vrot.lane.b32.xlu1 %v620_v25, %s2019_s6  ;;  %667 = vrot.lane.b32.xlu0 %v663_v27, %s2014_s4  ;;  %v875_v25 = vmul.f32 %v874_v20, %v2420_v5  ;;  %v887_v27 = vstv %s1748_s12  ;;  %s2523_s12 = sld [smem:[#allocation9 + $0x4e]] }
 0x141   : > { %v888_v33 = vmul.f32 %v887_v27, %v2433_v12  ;;  %v889_v39 = vmul.f32 %v887_v27, %v2443_v19 }
 0x142   : > { %v2366_v29 = vpop.permute.xlu0 %312 }
 0x144   : > { %669 = vrot.lane.b32.xlu1 %v664_v30, %s2014_s4  ;;  %695 = vrot.lane.b32.xlu0 %v691_v32, %s2015_s5  ;;  %v876_v30 = vmul.f32 %v874_v20, %v2427_v9 }
 0x146   : > { %v2372_v35 = vpop.permute.xlu1 %314  ;;  %v2374_v36 = vpop.permute.xlu0 %340 }
 0x148   : > { %697 = vrot.lane.b32.xlu1 %v692_v37, %s2015_s5  ;;  %723 = vrot.lane.b32.xlu0 %v719_v38, %s2016_s10  ;;  %v902_v37 = vstv %s1749_s20  ;;  %s2534_s20 = sld [smem:[#allocation9 + $0x1e]] }
 0x14a   : > { %v2380_v40 = vpop.permute.xlu1 %342  ;;  %v2383_v42 = vpop.permute.xlu0 %368 }
 0x14c   : > { %725 = vrot.lane.b32.xlu1 %v720_v41, %s2016_s10  ;;  %751 = vrot.lane.b32.xlu0 %v747_v43, %s2017_s13  ;;  %v903_v43 = vmul.f32 %v902_v37, %v2420_v5 }
 0x14e   : > { %v2388_v45 = vpop.permute.xlu1 %370  ;;  %v2391_v47 = vpop.permute.xlu0 %396 }
 0x150   : > { %753 = vrot.lane.b32.xlu1 %v748_v46, %s2017_s13  ;;  %779 = vrot.lane.b32.xlu0 %v775_v48, %s2018_s24  ;;  %v904_v48 = vmul.f32 %v902_v37, %v2427_v9 }
 0x152   : > { %v2396_v50 = vpop.permute.xlu1 %398  ;;  %v2399_v52 = vpop.permute.xlu0 %424 }
 0x154   : > { %781 = vrot.lane.b32.xlu1 %v776_v51, %s2018_s24  ;;  %792 = vrot.lane.b32.xlu0 %v788_v54, %s2018_s24  ;;  %v916_v51 = vmul.f32 %v915_v44, %v2433_v12  ;;  %v930_v54 = vstv %s1751_s30  ;;  %s2549_s30 = sld [smem:[#allocation9 + $0x4f]] }
 0x155   : > { %v931_v62 = vmul.f32 %v930_v54, %v2420_v5  ;;  %v932_v7 = vmul.f32 %v930_v54, %v2427_v9 }
 0x156   : > { %v2404_v56 = vpop.permute.xlu1 %426  ;;  %v2407_v58 = vpop.permute.xlu0 %452 }
 0x158   : > { %794 = vrot.lane.b32.xlu1 %v789_v57, %s2018_s24  ;;  %807 = vrot.lane.b32.xlu0 %v803_v60, %s2019_s6  ;;  %v917_v57 = vmul.f32 %v915_v44, %v2443_v19 }
 0x15a   : > { %v2414_v63 = vpop.permute.xlu1 %454  ;;  %v2417_v1 = vpop.permute.xlu0 %496 }
 0x15c   : > { %809 = vrot.lane.b32.xlu1 %v804_v0, %s2019_s6  ;;  %820 = vrot.lane.b32.xlu0 %v816_v3, %s2019_s6  ;;  %v943_v0 = vstv %s1752_s7  ;;  %s2551_s7 = sld [smem:[#allocation9 + $0x38]] }
 0x15e   : > { %v2424_v8 = vpop.permute.xlu1 %498  ;;  %v2429_v10 = vpop.permute.xlu0 %524 }
 0x160   : > { %822 = vrot.lane.b32.xlu1 %v817_v53, %s2019_s6  ;;  %851 = vrot.lane.b32.xlu0 %v847_v59, %s2014_s4  ;;  %v944_v59 = vmul.f32 %v943_v0, %v2433_v12 }
 0x162   : > { %v2437_v15 = vpop.permute.xlu1 %526  ;;  %v2440_v17 = vpop.permute.xlu0 %552 }
 0x164   : > { %853 = vrot.lane.b32.xlu1 %v848_v16, %s2014_s4  ;;  %864 = vrot.lane.b32.xlu0 %v860_v18, %s2014_s4  ;;  %v945_v18 = vmul.f32 %v943_v0, %v2443_v19 }
 0x166   : > { %v2447_v21 = vpop.permute.xlu1 %554  ;;  %v2450_v24 = vpop.permute.xlu0 %580 }
 0x168   : > { %866 = vrot.lane.b32.xlu1 %v861_v22, %s2014_s4  ;;  %879 = vrot.lane.b32.xlu0 %v875_v25, %s2015_s5  ;;  %v959_v22 = vmul.f32 %v958_v13, %v2420_v5  ;;  %v971_v25 = vstv %s1754_s9  ;;  %s2572_s9 = sld [smem:[#allocation9 + $0x50]] }
 0x169   : > { %v972_v37 = vmul.f32 %v971_v25, %v2433_v12 }
 0x16a   : > { %v2455_v28 = vpop.permute.xlu1 %582  ;;  %v2458_v32 = vpop.permute.xlu0 %608 }
 0x16c   : > { %881 = vrot.lane.b32.xlu1 %v876_v30, %s2015_s5  ;;  %892 = vrot.lane.b32.xlu0 %v888_v33, %s2015_s5  ;;  %v960_v30 = vmul.f32 %v958_v13, %v2427_v9 }
 0x16e   : > { %v2463_v38 = vpop.permute.xlu1 %610  ;;  %v2466_v41 = vpop.permute.xlu0 %636 }
 0x170   : > { %894 = vrot.lane.b32.xlu1 %v889_v39, %s2015_s5  ;;  %907 = vrot.lane.b32.xlu0 %v903_v43, %s2016_s10  ;;  %v986_v43 = vstv %s2494_s11  ;;  %s2584_s11 = sld [smem:[#allocation9 + $0x20]] }
 0x171   : > { %v988_v13 = vmul.f32 %v986_v43, %v2427_v9 }
 0x172   : > { %v2471_v46 = vpop.permute.xlu1 %638  ;;  %v2474_v49 = vpop.permute.xlu0 %680 }
 0x174   : > { %909 = vrot.lane.b32.xlu1 %v904_v48, %s2016_s10  ;;  %920 = vrot.lane.b32.xlu0 %v916_v51, %s2016_s10  ;;  %v973_v51 = vmul.f32 %v971_v25, %v2443_v19 }
 0x176   : > { %v2479_v55 = vpop.permute.xlu1 %682  ;;  %v2482_v60 = vpop.permute.xlu0 %708 }
 0x178   : > { %922 = vrot.lane.b32.xlu1 %v917_v57, %s2016_s10  ;;  %935 = vrot.lane.b32.xlu0 %v931_v62, %s2017_s13  ;;  %v987_v62 = vmul.f32 %v986_v43, %v2420_v5 }
 0x17a   : > { %v2487_v3 = vpop.permute.xlu1 %710  ;;  %v2490_v53 = vpop.permute.xlu0 %736 }
 0x17c   : > { %937 = vrot.lane.b32.xlu1 %v932_v7, %s2017_s13  ;;  %948 = vrot.lane.b32.xlu0 %v944_v59, %s2017_s13 }
 0x17e   : > { %v2497_v16 = vpop.permute.xlu1 %738  ;;  %v2500_v20 = vpop.permute.xlu0 %764 }
 0x180   : > { %950 = vrot.lane.b32.xlu1 %v945_v18, %s2017_s13  ;;  %963 = vrot.lane.b32.xlu0 %v959_v22, %s2018_s24 }
 0x182   : > { %v2507_v27 = vpop.permute.xlu1 %766  ;;  %v300_v33 = vpop.permute.xlu0 %299 }
 0x183   : > { %v305_v39 = vadd.f32 %v300_v33, %v2244_v61  ;;  %v999_v61 = vstv %s2504_s28  ;;  %v1030_v33 = vstv %s2514_s27  ;;  %s2594_s28 = sld [smem:[#allocation9 + $0x51]] }
 0x184   : > { %965 = vrot.lane.b32.xlu1 %v960_v30, %s2018_s24  ;;  %976 = vrot.lane.b32.xlu0 %v972_v37, %s2018_s24  ;;  %v1000_v22 = vmul.f32 %v999_v61, %v2433_v12  ;;  %v2531_v30 = vld [vmem:[#allocation2 + $0x4] sm:$0xff]  ;;  %s2602_s27 = sld [smem:[#allocation9 + $0x21]] }
 0x185   : > { %v318_v44 = vadd.f32 %v2366_v29, %v305_v39  ;;  %v1001_v39 = vmul.f32 %v999_v61, %v2443_v19 }
 0x186   : > { %v302_v48 = vpop.permute.xlu1 %301  ;;  %v328_v57 = vpop.permute.xlu0 %327 }
 0x187   : > { %v306_v54 = vadd.f32 %v302_v48, %v2250_v4  ;;  %v333_v0 = vadd.f32 %v328_v57, %v318_v44  ;;  %v1031_v48 = vmul.f32 %v1030_v33, %v2531_v30  ;;  %v1043_v57 = vstv %s2523_s12  ;;  %s2611_s12 = sld [smem:[#allocation9 + $0x52]] }
 0x188   : > { %978 = vrot.lane.b32.xlu1 %v973_v51, %s2018_s24  ;;  %991 = vrot.lane.b32.xlu0 %v987_v62, %s2019_s6  ;;  %v2543_v51 = vld [vmem:[#allocation2 + $0xc] sm:$0xff] }
 0x189   : > { %v319_v7 = vadd.f32 %v2372_v35, %v306_v54  ;;  %v346_v29 = vadd.f32 %v2374_v36, %v333_v0  ;;  %v1032_v61 = vmul.f32 %v1030_v33, %v2543_v51  ;;  %v464_v33 = vstv %s2540_s21  ;;  %s2622_s21 = sld [smem:[#allocation9 + $0x22]] }
 0x18a   : > { %v330_v59 = vpop.permute.xlu1 %329  ;;  %v356_v18 = vpop.permute.xlu0 %355 }
 0x18b   : > { %v334_v4 = vadd.f32 %v330_v59, %v319_v7  ;;  %v361_v25 = vadd.f32 %v356_v18, %v346_v29 }
 0x18c   : > { %993 = vrot.lane.b32.xlu1 %v988_v13, %s2019_s6  ;;  %1004 = vrot.lane.b32.xlu0 %v1000_v22, %s2019_s6  ;;  %v2558_v13 = vld [vmem:[#allocation3 + $0xc] sm:$0xff] }
 0x18d   : > { %v347_v35 = vadd.f32 %v2380_v40, %v334_v4  ;;  %v374_v36 = vadd.f32 %v2383_v42, %v361_v25  ;;  %v2546_v40 = vld [vmem:[#allocation3 + $0x4] sm:$0xff]  ;;  %v1045_v25 = vmul.f32 %v1043_v57, %v2558_v13 }
 0x18e   : > { %v358_v37 = vpop.permute.xlu1 %357  ;;  %v384_v44 = vpop.permute.xlu0 %383  ;;  %v1044_v59 = vmul.f32 %v1043_v57, %v2546_v40 }
 0x18f   : > { %v362_v43 = vadd.f32 %v358_v37, %v347_v35  ;;  %v389_v54 = vadd.f32 %v384_v44, %v374_v36 }
 0x190   : > { %1006 = vrot.lane.b32.xlu1 %v1001_v39, %s2019_s6  ;;  %1035 = vrot.lane.b32.xlu0 %v1031_v48, %s2014_s4 }
 0x191   : > { %v375_v42 = vadd.f32 %v2388_v45, %v362_v43  ;;  %v402_v62 = vadd.f32 %v2391_v47, %v389_v54  ;;  %v1058_v45 = vstv %s2534_s20  ;;  %v1071_v43 = vstv %s2549_s30  ;;  %s2617_s20 = sld [smem:[#allocation9 + $0xe]]  ;;  %s2624_s30 = sld [smem:[#allocation9 + $0x3f]] }
 0x192   : > { %v386_v0 = vpop.permute.xlu1 %385  ;;  %v412_v29 = vpop.permute.xlu0 %411  ;;  %v1059_v37 = vmul.f32 %v1058_v45, %v2531_v30  ;;  %v1060_v57 = vmul.f32 %v1058_v45, %v2543_v51 }
 0x193   : > { %v390_v7 = vadd.f32 %v386_v0, %v375_v42  ;;  %v417_v4 = vadd.f32 %v412_v29, %v402_v62  ;;  %v1072_v0 = vmul.f32 %v1071_v43, %v2546_v40 }
 0x194   : > { %1037 = vrot.lane.b32.xlu1 %v1032_v61, %s2014_s4  ;;  %1048 = vrot.lane.b32.xlu0 %v1044_v59, %s2014_s4 }
 0x195   : > { %v403_v47 = vadd.f32 %v2396_v50, %v390_v7  ;;  %v430_v18 = vadd.f32 %v2399_v52, %v417_v4  ;;  %v471_v50 = vstv %s2551_s7  ;;  %v465_v52 = vmul.f32 %v464_v33, %v2328_v2  ;;  %s2633_s7 = sld [smem:[#allocation9 + $0x53]] }
 0x196   : > { %v414_v22 = vpop.permute.xlu1 %413  ;;  %v440_v36 = vpop.permute.xlu0 %439  ;;  %v472_v61 = vmul.f32 %v471_v50, %v2257_v11  ;;  %v466_v2 = vmul.f32 %v464_v33, %v2333_v6  ;;  %v1073_v4 = vmul.f32 %v1071_v43, %v2558_v13  ;;  %v473_v45 = vmul.f32 %v471_v50, %v2261_v14 }
 0x197   : > { %v418_v35 = vadd.f32 %v414_v22, %v403_v47  ;;  %v445_v39 = vadd.f32 %v440_v36, %v430_v18  ;;  %v1114_v43 = vstv %s2584_s11  ;;  %s2667_s11 = sld [smem:[#allocation9 + $0x25]] }
 0x198   : > { %1050 = vrot.lane.b32.xlu1 %v1045_v25, %s2014_s4  ;;  %1063 = vrot.lane.b32.xlu0 %v1059_v37, %s2015_s5  ;;  %v1099_v25 = vstv %s2572_s9  ;;  %s2655_s9 = sld [smem:[#allocation9 + $0x55]] }
 0x199   : > { %v431_v44 = vadd.f32 %v2404_v56, %v418_v35  ;;  %v458_v48 = vadd.f32 %v2407_v58, %v445_v39  ;;  %v1086_v56 = vstv %s2562_s8  ;;  %v1100_v37 = vmul.f32 %v1099_v25, %v2546_v40  ;;  %s2643_s8 = sld [smem:[#allocation9 + $0x24]] }
 0x19a   : > { %v442_v54 = vpop.permute.xlu1 %441  ;;  %v484_v62 = vpop.permute.xlu0 %483  ;;  %v1087_v18 = vmul.f32 %v1086_v56, %v2531_v30  ;;  %v1088_v35 = vmul.f32 %v1086_v56, %v2543_v51 }
 0x19b   : > { %v446_v42 = vadd.f32 %v442_v54, %v431_v44  ;;  %v467_v7 = vadd.f32 %v465_v52, %v458_v48  ;;  %v1101_v52 = vmul.f32 %v1099_v25, %v2558_v13 }
 0x19c   : > { %1065 = vrot.lane.b32.xlu1 %v1060_v57, %s2015_s5  ;;  %1076 = vrot.lane.b32.xlu0 %v1072_v0, %s2015_s5  ;;  %v1115_v57 = vmul.f32 %v1114_v43, %v2531_v30 }
 0x19d   : > { %v459_v58 = vadd.f32 %v2414_v63, %v446_v42  ;;  %v474_v29 = vadd.f32 %v472_v61, %v467_v7  ;;  %v1116_v61 = vmul.f32 %v1114_v43, %v2543_v51 }
 0x19e   : > { %v486_v59 = vpop.permute.xlu1 %485  ;;  %v512_v47 = vpop.permute.xlu0 %511 }
 0x19f   : > { %v468_v11 = vadd.f32 %v466_v2, %v459_v58  ;;  %v489_v22 = vadd.f32 %v484_v62, %v474_v29  ;;  %v1127_v62 = vstv %s2594_s28  ;;  %v1142_v29 = vstv %s2602_s27  ;;  %s2679_s28 = sld [smem:[#allocation9 + $0x56]] }
 0x1a0   : > { %1078 = vrot.lane.b32.xlu1 %v1073_v4, %s2015_s5  ;;  %1091 = vrot.lane.b32.xlu0 %v1087_v18, %s2016_s10  ;;  %v1128_v2 = vmul.f32 %v1127_v62, %v2546_v40  ;;  %v1129_v4 = vmul.f32 %v1127_v62, %v2558_v13  ;;  %s2690_s27 = sld [smem:[#allocation9 + $0x26]] }
 0x1a1   : > { %v475_v6 = vadd.f32 %v473_v45, %v468_v11  ;;  %v502_v63 = vadd.f32 %v2417_v1, %v489_v22  ;;  %v1155_v22 = vstv %s2611_s12  ;;  %s2696_s12 = sld [smem:[#allocation9 + $0x15]] }
 0x1a2   : > { %v514_v33 = vpop.permute.xlu1 %513  ;;  %v540_v36 = vpop.permute.xlu0 %539 }
 0x1a3   : > { %v490_v14 = vadd.f32 %v486_v59, %v475_v6  ;;  %v517_v39 = vadd.f32 %v512_v47, %v502_v63  ;;  %v1143_v47 = vmul.f32 %v1142_v29, %v2531_v30  ;;  %v1144_v6 = vmul.f32 %v1142_v29, %v2543_v51 }
 0x1a4   : > { %1093 = vrot.lane.b32.xlu1 %v1088_v35, %s2016_s10  ;;  %1104 = vrot.lane.b32.xlu0 %v1100_v37, %s2016_s10  ;;  %v648_v63 = vstv %s2617_s20  ;;  %v1170_v37 = vstv %s2622_s21  ;;  %s2701_s20 = sld [smem:[#allocation9 + $0x57]]  ;;  %s2705_s21 = sld [smem:[#allocation9 + $0x46]] }
 0x1a5   : > { %v503_v50 = vadd.f32 %v2424_v8, %v490_v14  ;;  %v530_v1 = vadd.f32 %v2429_v10, %v517_v39  ;;  %v1156_v14 = vmul.f32 %v1155_v22, %v2546_v40 }
 0x1a6   : > { %v542_v44 = vpop.permute.xlu1 %541  ;;  %v568_v54 = vpop.permute.xlu0 %567 }
 0x1a7   : > { %v518_v48 = vadd.f32 %v514_v33, %v503_v50  ;;  %v545_v42 = vadd.f32 %v540_v36, %v530_v1  ;;  %v1157_v1 = vmul.f32 %v1155_v22, %v2558_v13 }
 0x1a8   : > { %1106 = vrot.lane.b32.xlu1 %v1101_v52, %s2016_s10  ;;  %1119 = vrot.lane.b32.xlu0 %v1115_v57, %s2017_s13 }
 0x1a9   : > { %v531_v8 = vadd.f32 %v2437_v15, %v518_v48  ;;  %v558_v10 = vadd.f32 %v2440_v17, %v545_v42  ;;  %v1171_v48 = vmul.f32 %v1170_v37, %v2531_v30 }
 0x1aa   : > { %v570_v0 = vpop.permute.xlu1 %569  ;;  %v596_v56 = vpop.permute.xlu0 %595 }
 0x1ab   : > { %v546_v7 = vadd.f32 %v542_v44, %v531_v8  ;;  %v573_v58 = vadd.f32 %v568_v54, %v558_v10  ;;  %v1172_v8 = vmul.f32 %v1170_v37, %v2543_v51 }
 0x1ac   : > { %1121 = vrot.lane.b32.xlu1 %v1116_v61, %s2017_s13  ;;  %1132 = vrot.lane.b32.xlu0 %v1128_v2, %s2017_s13 }
 0x1ad   : > { %v559_v15 = vadd.f32 %v2447_v21, %v546_v7  ;;  %v586_v17 = vadd.f32 %v2450_v24, %v573_v58 }
 0x1ae   : > { %v598_v59 = vpop.permute.xlu1 %597  ;;  %v624_v11 = vpop.permute.xlu0 %623 }
 0x1af   : > { %v574_v45 = vadd.f32 %v570_v0, %v559_v15  ;;  %v601_v18 = vadd.f32 %v596_v56, %v586_v17  ;;  %v2664_v56 = vld [vmem:[#allocation2 + $0x5] sm:$0xff] }
 0x1b0   : > { %1134 = vrot.lane.b32.xlu1 %v1129_v4, %s2017_s13  ;;  %1147 = vrot.lane.b32.xlu0 %v1143_v47, %s2018_s24 }
 0x1b1   : > { %v587_v21 = vadd.f32 %v2455_v28, %v574_v45  ;;  %v614_v24 = vadd.f32 %v2458_v32, %v601_v18  ;;  %v655_v28 = vstv %s2624_s30  ;;  %v649_v32 = vmul.f32 %v648_v63, %v2356_v23  ;;  %v2676_v45 = vld [vmem:[#allocation3 + $0x5] sm:$0xff]  ;;  %s2712_s30 = sld [smem:[#allocation9 + $0x27]] }
 0x1b2   : > { %v626_v25 = vpop.permute.xlu1 %625  ;;  %v668_v35 = vpop.permute.xlu0 %667  ;;  %v656_v54 = vmul.f32 %v655_v28, %v2284_v31  ;;  %v650_v23 = vmul.f32 %v648_v63, %v2361_v26  ;;  %v657_v10 = vmul.f32 %v655_v28, %v2289_v34  ;;  %v1214_v26 = vstv %s2643_s8  ;;  %s2731_s8 = sld [smem:[#allocation9 + $0x28]] }
 0x1b3   : > { %v602_v33 = vadd.f32 %v598_v59, %v587_v21  ;;  %v629_v36 = vadd.f32 %v624_v11, %v614_v24  ;;  %v1215_v17 = vmul.f32 %v1214_v26, %v2664_v56  ;;  %v2673_v59 = vld [vmem:[#allocation2 + $0xd] sm:$0xff]  ;;  %v1227_v11 = vstv %s2655_s9  ;;  %s2740_s9 = sld [smem:[#allocation9 + $0x59]] }
 0x1b4   : > { %1149 = vrot.lane.b32.xlu1 %v1144_v6, %s2018_s24  ;;  %1160 = vrot.lane.b32.xlu0 %v1156_v14, %s2018_s24  ;;  %v1216_v22 = vmul.f32 %v1214_v26, %v2673_v59  ;;  %v2686_v6 = vld [vmem:[#allocation3 + $0xd] sm:$0xff] }
 0x1b5   : > { %v615_v39 = vadd.f32 %v2463_v38, %v602_v33  ;;  %v642_v43 = vadd.f32 %v2466_v41, %v629_v36  ;;  %v1183_v38 = vstv %s2633_s7  ;;  %v1242_v33 = vstv %s2667_s11  ;;  %s2721_s7 = sld [smem:[#allocation9 + $0x58]]  ;;  %s2747_s11 = sld [smem:[#allocation9 + $0x29]] }
 0x1b6   : > { %v670_v50 = vpop.permute.xlu1 %669  ;;  %v696_v52 = vpop.permute.xlu0 %695  ;;  %v1184_v61 = vmul.f32 %v1183_v38, %v2546_v40  ;;  %v1185_v34 = vmul.f32 %v1183_v38, %v2558_v13  ;;  %v1229_v14 = vmul.f32 %v1227_v11, %v2686_v6  ;;  %v1243_v28 = vmul.f32 %v1242_v33, %v2664_v56 }
 0x1b7   : > { %v630_v44 = vadd.f32 %v626_v25, %v615_v39  ;;  %v651_v57 = vadd.f32 %v649_v32, %v642_v43  ;;  %v1228_v25 = vmul.f32 %v1227_v11, %v2676_v45  ;;  %v1255_v32 = vstv %s2679_s28  ;;  %s2754_s28 = sld [smem:[#allocation9 + $0x5a]] }
 0x1b8   : > { %1162 = vrot.lane.b32.xlu1 %v1157_v1, %s2018_s24  ;;  %1175 = vrot.lane.b32.xlu0 %v1171_v48, %s2019_s6  ;;  %v1257_v38 = vmul.f32 %v1255_v32, %v2686_v6 }
 0x1b9   : > { %v643_v41 = vadd.f32 %v2471_v46, %v630_v44  ;;  %v658_v42 = vadd.f32 %v656_v54, %v651_v57  ;;  %v1270_v54 = vstv %s2690_s27  ;;  %s2761_s27 = sld [smem:[#allocation9 + $0x2b]] }
 0x1ba   : > { %v698_v62 = vpop.permute.xlu1 %697  ;;  %v724_v0 = vpop.permute.xlu0 %723  ;;  %v1272_v26 = vmul.f32 %v1270_v54, %v2673_v59 }
 0x1bb   : > { %v652_v31 = vadd.f32 %v650_v23, %v643_v41  ;;  %v673_v7 = vadd.f32 %v668_v35, %v658_v42  ;;  %v832_v23 = vstv %s2696_s12  ;;  %s2768_s12 = sld [smem:[#allocation9 + $0x5c]] }
 0x1bc   : > { %1177 = vrot.lane.b32.xlu1 %v1172_v8, %s2019_s6  ;;  %1188 = vrot.lane.b32.xlu0 %v1184_v61, %s2019_s6 }
 0x1bd   : > { %v659_v46 = vadd.f32 %v657_v10, %v652_v31  ;;  %v686_v2 = vadd.f32 %v2474_v49, %v673_v7  ;;  %v1283_v10 = vstv %s2701_s20  ;;  %s2777_s20 = sld [smem:[#allocation9 + $0x2c]] }
 0x1be   : > { %v726_v58 = vpop.permute.xlu1 %725  ;;  %v752_v15 = vpop.permute.xlu0 %751 }
 0x1bf   : > { %v674_v29 = vadd.f32 %v670_v50, %v659_v46  ;;  %v701_v4 = vadd.f32 %v696_v52, %v686_v2  ;;  %v1244_v50 = vmul.f32 %v1242_v33, %v2673_v59  ;;  %v1256_v52 = vmul.f32 %v1255_v32, %v2676_v45 }
 0x1c0   : > { %1190 = vrot.lane.b32.xlu1 %v1185_v34, %s2019_s6  ;;  %1219 = vrot.lane.b32.xlu0 %v1215_v17, %s2014_s4  ;;  %v834_v17 = vmul.f32 %v832_v23, %v2427_v9 }
 0x1c1   : > { %v687_v49 = vadd.f32 %v2479_v55, %v674_v29  ;;  %v714_v47 = vadd.f32 %v2482_v60, %v701_v4 }
 0x1c2   : > { %v754_v18 = vpop.permute.xlu1 %753  ;;  %v780_v24 = vpop.permute.xlu0 %779 }
 0x1c3   : > { %v702_v21 = vadd.f32 %v698_v62, %v687_v49  ;;  %v729_v63 = vadd.f32 %v724_v0, %v714_v47  ;;  %v1271_v62 = vmul.f32 %v1270_v54, %v2664_v56  ;;  %v833_v0 = vmul.f32 %v832_v23, %v2420_v5 }
 0x1c4   : > { %1221 = vrot.lane.b32.xlu1 %v1216_v22, %s2014_s4  ;;  %1232 = vrot.lane.b32.xlu0 %v1228_v25, %s2014_s4  ;;  %v1285_v49 = vmul.f32 %v1283_v10, %v2686_v6 }
 0x1c5   : > { %v715_v55 = vadd.f32 %v2487_v3, %v702_v21  ;;  %v742_v60 = vadd.f32 %v2490_v53, %v729_v63 }
 0x1c6   : > { %v782_v35 = vpop.permute.xlu1 %781  ;;  %v793_v37 = vpop.permute.xlu0 %792 }
 0x1c7   : > { %v730_v36 = vadd.f32 %v726_v58, %v715_v55  ;;  %v757_v39 = vadd.f32 %v752_v15, %v742_v60  ;;  %v1284_v58 = vmul.f32 %v1283_v10, %v2676_v45  ;;  %v1298_v15 = vstv %s2712_s30  ;;  %s2797_s30 = sld [smem:[#allocation9 + $0x2d]] }
 0x1c8   : > { %1234 = vrot.lane.b32.xlu1 %v1229_v14, %s2014_s4  ;;  %1247 = vrot.lane.b32.xlu0 %v1243_v28, %s2015_s5  ;;  %v1299_v22 = vmul.f32 %v1298_v15, %v2664_v56  ;;  %v1300_v33 = vmul.f32 %v1298_v15, %v2673_v59  ;;  %v1326_v14 = vstv %s2731_s8  ;;  %v2782_v15 = vld [vmem:[#allocation2 + $0xe] sm:$0xff]  ;;  %s2804_s8 = sld [smem:[#allocation9 + $0x4d]] }
 0x1c9   : > { %v743_v3 = vadd.f32 %v2497_v16, %v730_v36  ;;  %v770_v53 = vadd.f32 %v2500_v20, %v757_v39 }
 0x1ca   : > { %v795_v43 = vpop.permute.xlu1 %794  ;;  %v808_v44 = vpop.permute.xlu0 %807 }
 0x1cb   : > { %v758_v1 = vadd.f32 %v754_v18, %v743_v3  ;;  %v785_v48 = vadd.f32 %v780_v24, %v770_v53  ;;  %v1311_v24 = vstv %s2721_s7  ;;  %v1327_v3 = vmul.f32 %v1326_v14, %v2664_v56  ;;  %s2800_s7 = sld [smem:[#allocation9 + $0x1c]] }
 0x1cc   : > { %1249 = vrot.lane.b32.xlu1 %v1244_v50, %s2015_s5  ;;  %1260 = vrot.lane.b32.xlu0 %v1256_v52, %s2015_s5  ;;  %v1312_v60 = vmul.f32 %v1311_v24, %v2676_v45  ;;  %v1313_v28 = vmul.f32 %v1311_v24, %v2686_v6  ;;  %v1426_v24 = vstv %s2777_s20  ;;  %s1805_s20 = sshll.u32 %s2067_s2, 10 }
 0x1cd   : > { %v771_v16 = vadd.f32 %v2507_v27, %v758_v1  ;;  %v798_v20 = vadd.f32 %v793_v37, %v785_v48  ;;  %v839_v27 = vstv %s2705_s21  ;;  %v1328_v1 = vmul.f32 %v1326_v14, %v2673_v59  ;;  %s2788_s21 = sld [smem:[#allocation9 + $0x5d]] }
 0x1ce   : > { %v810_v57 = vpop.permute.xlu1 %809  ;;  %v821_v42 = vpop.permute.xlu0 %820  ;;  %v840_v34 = vmul.f32 %v839_v27, %v2433_v12  ;;  %v841_v47 = vmul.f32 %v839_v27, %v2443_v19  ;;  %v1428_v14 = vmul.f32 %v1426_v24, %v2782_v15 }
 0x1cf   : > { %v786_v41 = vadd.f32 %v782_v35, %v771_v16  ;;  %v813_v8 = vadd.f32 %v808_v44, %v798_v20  ;;  %v1354_v16 = vstv %s2747_s11  ;;  %s2815_s11 = sld [smem:[#allocation9 + $0x2e]] }
 0x1d0   : > { %1262 = vrot.lane.b32.xlu1 %v1257_v38, %s2015_s5  ;;  %1275 = vrot.lane.b32.xlu0 %v1271_v62, %s2016_s10  ;;  %v1367_v62 = vstv %s2754_s28  ;;  %v1356_v10 = vmul.f32 %v1354_v16, %v2673_v59  ;;  %s1796_s28 = sld [smem:[#allocation9 + $0x60]] }
 0x1d1   : > { %v799_v31 = vadd.f32 %v795_v43, %v786_v41  ;;  %v826_v61 = vadd.f32 %v821_v42, %v813_v8  ;;  %v1339_v43 = vstv %s2740_s9  ;;  %v1355_v41 = vmul.f32 %v1354_v16, %v2664_v56  ;;  %s2808_s9 = sld [smem:[#allocation9 + $0x5e]] }
 0x1d2   : > { %v823_v7 = vpop.permute.xlu1 %822  ;;  %v852_v2 = vpop.permute.xlu0 %851  ;;  %v1340_v48 = vmul.f32 %v1339_v43, %v2676_v45 }
 0x1d3   : > { %v814_v46 = vadd.f32 %v810_v57, %v799_v31  ;;  %v835_v29 = vadd.f32 %v833_v0, %v826_v61  ;;  %v1341_v57 = vmul.f32 %v1339_v43, %v2686_v6  ;;  %v1368_v0 = vmul.f32 %v1367_v62, %v2676_v45 }
 0x1d4   : > { %1277 = vrot.lane.b32.xlu1 %v1272_v26, %s2016_s10  ;;  %1288 = vrot.lane.b32.xlu0 %v1284_v58, %s2016_s10  ;;  %v1398_v26 = vstv %s2761_s27  ;;  %s1797_s27 = sld [smem:[#allocation9 + $0x30]] }
 0x1d5   : > { %v827_v5 = vadd.f32 %v823_v7, %v814_v46  ;;  %v842_v4 = vadd.f32 %v840_v34, %v835_v29  ;;  %v2774_v7 = vld [vmem:[#allocation2 + $0x6] sm:$0xff] }
 0x1d6   : > { %v854_v11 = vpop.permute.xlu1 %853  ;;  %v865_v12 = vpop.permute.xlu0 %864  ;;  %v1399_v29 = vmul.f32 %v1398_v26, %v2774_v7 }
 0x1d7   : > { %v836_v18 = vadd.f32 %v834_v17, %v827_v5  ;;  %v857_v21 = vadd.f32 %v852_v2, %v842_v4  ;;  %v1369_v2 = vmul.f32 %v1367_v62, %v2686_v6  ;;  %v2785_v5 = vld [vmem:[#allocation3 + $0x6] sm:$0xff]  ;;  %v1411_v4 = vstv %s2768_s12  ;;  %s1786_s12 = sld [smem:[#allocation9 + $0x5b]] }
 0x1d8   : > { %1290 = vrot.lane.b32.xlu1 %v1285_v49, %s2016_s10  ;;  %1303 = vrot.lane.b32.xlu0 %v1299_v22, %s2017_s13  ;;  %v1400_v49 = vmul.f32 %v1398_v26, %v2782_v15  ;;  %v2793_v22 = vld [vmem:[#allocation3 + $0xe] sm:$0xff] }
 0x1d9   : > { %v843_v9 = vadd.f32 %v841_v47, %v836_v18  ;;  %v870_v25 = vadd.f32 %v865_v12, %v857_v21  ;;  %v1412_v12 = vmul.f32 %v1411_v4, %v2785_v5 }
 0x1da   : > { %v867_v63 = vpop.permute.xlu1 %866  ;;  %v880_v19 = vpop.permute.xlu0 %879 }
 0x1db   : > { %v858_v55 = vadd.f32 %v854_v11, %v843_v9  ;;  %v885_v35 = vadd.f32 %v880_v19, %v870_v25  ;;  %v1413_v25 = vmul.f32 %v1411_v4, %v2793_v22 }
 0x1dc   : > { %1305 = vrot.lane.b32.xlu1 %v1300_v33, %s2017_s13  ;;  %1316 = vrot.lane.b32.xlu0 %v1312_v60, %s2017_s13  ;;  %v1439_v60 = vstv %s2788_s21  ;;  %s203_s21 = scalar_lea.vmem [#allocation10], %s1699_s23 }
 0x1dd   : > { %v871_v36 = vadd.f32 %v867_v63, %v858_v55  ;;  %v1427_v55 = vmul.f32 %v1426_v24, %v2774_v7  ;;  %v1441_v43 = vmul.f32 %v1439_v60, %v2793_v22 }
 0x1de   : > { %v882_v37 = vpop.permute.xlu1 %881  ;;  %v893_v32 = vpop.permute.xlu0 %892 }
 0x1df   : > { %v886_v39 = vadd.f32 %v882_v37, %v871_v36  ;;  %v898_v53 = vadd.f32 %v893_v32, %v885_v35  ;;  %v1016_v32 = vstv %s2800_s7  ;;  %s2885_s7 = scalar_lea.hbm %s2942_s3, %s1805_s20 }
 0x1e0   : > { %1318 = vrot.lane.b32.xlu1 %v1313_v28, %s2017_s13  ;;  %1331 = vrot.lane.b32.xlu0 %v1327_v3, %s2018_s24  ;;  %v1440_v28 = vmul.f32 %v1439_v60, %v2785_v5 }
 0x1e2   : > { %v895_v50 = vpop.permute.xlu1 %894  ;;  %v908_v52 = vpop.permute.xlu0 %907 }
 0x1e3   : > { %v899_v44 = vadd.f32 %v895_v50, %v886_v39  ;;  %v913_v54 = vadd.f32 %v908_v52, %v898_v53  ;;  %v1454_v39 = vstv %s2797_s30  ;;  %v1023_v50 = vstv %s2804_s8  ;;  %s1606_s30 = sshll.u32 %s203_s21, 4  ;;  %s1593_s8 = scalar_lea.sflag [#allocation7], %s2173_s18  ;;  %s2887_s30 = int_to_ptr.vmem [resolvable:$true] %s1606_s30 }
 0x1e4   : > { %1333 = vrot.lane.b32.xlu1 %v1328_v1, %s2018_s24  ;;  %1344 = vrot.lane.b32.xlu0 %v1340_v48, %s2018_s24  ;;  %v1017_v52 = vmul.f32 %v1016_v32, %v2531_v30 }
 0x1e6   : > { %v910_v20 = vpop.permute.xlu1 %909  ;;  %v921_v23 = vpop.permute.xlu0 %920 }
 0x1e7   : > { %v914_v38 = vadd.f32 %v910_v20, %v899_v44  ;;  %v926_v42 = vadd.f32 %v921_v23, %v913_v54  ;;  %v1455_v44 = vmul.f32 %v1454_v39, %v2774_v7  ;;  %v1467_v54 = vstv %s2808_s9  ;;  %s1936_s9 = scalar_lea.vmem %s2887_s30, 1024 }
 0x1e8   : > { %1346 = vrot.lane.b32.xlu1 %v1341_v57, %s2018_s24  ;;  %1359 = vrot.lane.b32.xlu0 %v1355_v41, %s2019_s6  ;;  %v1024_v20 = vmul.f32 %v1023_v50, %v2546_v40  ;;  %v1456_v23 = vmul.f32 %v1454_v39, %v2782_v15  ;;  %v1018_v41 = vmul.f32 %v1016_v32, %v2543_v51  ;;  %p1937_p5 = scmp.ne.s32.totalorder %s2887_s30, %s1936_s9 }
 0x1e9   : > { %v1468_v62 = vmul.f32 %v1467_v54, %v2785_v5 }
 0x1ea   : > { %v923_v8 = vpop.permute.xlu1 %922  ;;  %v936_v27 = vpop.permute.xlu0 %935  ;;  %p1938_p8 = pnand %p1937_p5, %p2956_p12 }
 0x1eb   : > { %v927_v31 = vadd.f32 %v923_v8, %v914_v38  ;;  %v941_v61 = vadd.f32 %v936_v27, %v926_v42 }
 0x1ec   : > { %1361 = vrot.lane.b32.xlu1 %v1356_v10, %s2019_s6  ;;  %1372 = vrot.lane.b32.xlu0 %v1368_v0, %s2019_s6  ;;  %v1482_v10 = vstv %s2815_s11  ;;  %v1469_v0 = vmul.f32 %v1467_v54, %v2793_v22  ;;  %p1939_p9 = pneg %p1938_p8  ;;  %s2020_s11 = smov [#allocation10]  }
 0x1ed   : > { %v1483_v26 = vmul.f32 %v1482_v10, %v2774_v7 }
 0x1ee   : > { %v938_v46 = vpop.permute.xlu1 %937  ;;  %v949_v34 = vpop.permute.xlu0 %948 }
 0x1ef   : > { %v942_v58 = vadd.f32 %v938_v46, %v927_v31  ;;  %v954_v17 = vadd.f32 %v949_v34, %v941_v61  ;;  %v1025_v31 = vmul.f32 %v1023_v50, %v2558_v13 }
 0x1f0   : > { %1374 = vrot.lane.b32.xlu1 %v1369_v2, %s2019_s6  ;;  %1403 = vrot.lane.b32.xlu0 %v1399_v29, %s2014_s4 }
 0x1f2   : > { %v951_v11 = vpop.permute.xlu1 %950  ;;  %v964_v18 = vpop.permute.xlu0 %963 }
 0x1f3   : > { %v955_v47 = vadd.f32 %v951_v11, %v942_v58  ;;  %v969_v21 = vadd.f32 %v964_v18, %v954_v17  ;;  %v1484_v58 = vmul.f32 %v1482_v10, %v2782_v15 }
 0x1f4   : > { %1405 = vrot.lane.b32.xlu1 %v1400_v49, %s2014_s4  ;;  %1416 = vrot.lane.b32.xlu0 %v1412_v12, %s2014_s4 }
 0x1f6   : > { %v966_v9 = vpop.permute.xlu1 %965  ;;  %v977_v33 = vpop.permute.xlu0 %976 }
 0x1f7   : > { %v970_v63 = vadd.f32 %v966_v9, %v955_v47  ;;  %v982_v19 = vadd.f32 %v977_v33, %v969_v21  ;;  %v1523_v47 = vstv %s1796_s28  ;;  %v1538_v9 = vstv %s1797_s27 }
 0x1f8   : > { %1418 = vrot.lane.b32.xlu1 %v1413_v25, %s2014_s4  ;;  %1431 = vrot.lane.b32.xlu0 %v1427_v55, %s2015_s5  ;;  %s2825_s4 = sld [smem:[#allocation9 + $0x5f]]  ;;  %v1524_v24 = vmul.f32 %v1523_v47, %v2785_v5  ;;  %v1539_v55 = vmul.f32 %v1538_v9, %v2774_v7 }
 0x1fa   : > { %v979_v35 = vpop.permute.xlu1 %978  ;;  %v992_v37 = vpop.permute.xlu0 %991 }
 0x1fb   : > { %v983_v36 = vadd.f32 %v979_v35, %v970_v63  ;;  %v997_v3 = vadd.f32 %v992_v37, %v982_v19  ;;  %v1525_v63 = vmul.f32 %v1523_v47, %v2793_v22 }
 0x1fc   : > { %1433 = vrot.lane.b32.xlu1 %v1428_v14, %s2015_s5  ;;  %1444 = vrot.lane.b32.xlu0 %v1440_v28, %s2015_s5  ;;  %v1540_v14 = vmul.f32 %v1538_v9, %v2782_v15 }
 0x1fe   : > { %v994_v53 = vpop.permute.xlu1 %993  ;;  %v1005_v1 = vpop.permute.xlu0 %1004  ;;  %v1495_v46 = vstv %s2825_s4  ;;  %s1940_s4 = sshll.u32 %s2020_s11, 4  ;;  %s1941_s4 = int_to_ptr.vmem [resolvable:$false] %s1940_s4 }
 0x1ff   : > { %v1010_v48 = vadd.f32 %v1005_v1, %v997_v3  ;;  %v998_v16 = vadd.f32 %v994_v53, %v983_v36  ;;  %v1496_v34 = vmul.f32 %v1495_v46, %v2785_v5  ;;  %v1497_v4 = vmul.f32 %v1495_v46, %v2793_v22  ;;  %p1943_p10 = scmp.lt.s32.totalorder %s2887_s30, %s1941_s4 }
 0x200   : > { %1446 = vrot.lane.b32.xlu1 %v1441_v43, %s2015_s5  ;;  %1459 = vrot.lane.b32.xlu0 %v1455_v44, %s2016_s10  ;;  %s1795_s5 = sld [smem:[#allocation9 + $0x2f]] }
 0x201   : > { %v1019_v57 = vadd.f32 %v1017_v52, %v1010_v48 }
 0x202   : > { %v1007_v38 = vpop.permute.xlu1 %1006  ;;  %v1036_v30 = vpop.permute.xlu0 %1035 }
 0x203   : > { %v1011_v42 = vadd.f32 %v1007_v38, %v998_v16  ;;  %v1026_v8 = vadd.f32 %v1024_v20, %v1019_v57 }
 0x204   : > { %1461 = vrot.lane.b32.xlu1 %v1456_v23, %s2016_s10  ;;  %1472 = vrot.lane.b32.xlu0 %v1468_v62, %s2016_s10 }
 0x205   : > { %v1020_v27 = vadd.f32 %v1018_v41, %v1011_v42  ;;  %v1041_v19 = vadd.f32 %v1036_v30, %v1026_v8 }
 0x206   : > { %v1038_v40 = vpop.permute.xlu1 %1037  ;;  %v1049_v51 = vpop.permute.xlu0 %1048  ;;  %v1510_v29 = vstv %s1795_s5  ;;  %s1942_s5 = scalar_lea.vmem %s1941_s4, 2048 }
 0x207   : > { %v1027_v61 = vadd.f32 %v1025_v31, %v1020_v27  ;;  %v1511_v49 = vmul.f32 %v1510_v29, %v2774_v7  ;;  %v1512_v12 = vmul.f32 %v1510_v29, %v2782_v15  ;;  %v1054_v39 = vadd.f32 %v1049_v51, %v1041_v19  ;;  %p1944_p1 = scmp.lt.s32.totalorder %s1942_s5, %s1936_s9 }
 0x208   : > { %1474 = vrot.lane.b32.xlu1 %v1469_v0, %s2016_s10  ;;  %1487 = vrot.lane.b32.xlu0 %v1483_v26, %s2017_s13  ;;  %s1798_s10 = sld [smem:[#allocation9 + $0x61]] }
 0x209   : > { %v1042_v36 = vadd.f32 %v1038_v40, %v1027_v61  ;;  %p1945_p4 = por %p1944_p1, %p1943_p10 }
 0x20a   : > { %v1051_v2 = vpop.permute.xlu1 %1050  ;;  %v1064_v13 = vpop.permute.xlu0 %1063 }
 0x20b   : > { %v1069_v32 = vadd.f32 %v1064_v13, %v1054_v39  ;;  %v1055_v43 = vadd.f32 %v1051_v2, %v1042_v36  ;;  %p1946_p11 = pnand %p1945_p4, %p1939_p9 }
 0x20c   : > { %1489 = vrot.lane.b32.xlu1 %v1484_v58, %s2017_s13  ;;  %1500 = vrot.lane.b32.xlu0 %v1496_v34, %s2017_s13 }
 0x20e   : > { %v1066_v17 = vpop.permute.xlu1 %1065  ;;  %v1077_v11 = vpop.permute.xlu0 %1076  ;;  %v1551_v60 = vstv %s1798_s10 }
 0x20f   : > { %v1552_v28 = vmul.f32 %v1551_v60, %v2785_v5  ;;  %v1553_v53 = vmul.f32 %v1551_v60, %v2793_v22  ;;  %v1082_v1 = vadd.f32 %v1077_v11, %v1069_v32  ;;  %v1070_v44 = vadd.f32 %v1066_v17, %v1055_v43 }
 0x210   : > { %1502 = vrot.lane.b32.xlu1 %v1497_v4, %s2017_s13  ;;  %1515 = vrot.lane.b32.xlu0 %v1511_v49, %s2018_s24  ;;  %s1771_s13 = sld [smem:[#allocation9 + $0x23]] }
 0x212   : > { %v1079_v18 = vpop.permute.xlu1 %1078  ;;  %v1092_v21 = vpop.permute.xlu0 %1091 }
 0x213   : > { %v1097_v52 = vadd.f32 %v1092_v21, %v1082_v1  ;;  %v1083_v54 = vadd.f32 %v1079_v18, %v1070_v44 }
 0x214   : > { %1517 = vrot.lane.b32.xlu1 %v1512_v12, %s2018_s24  ;;  %1528 = vrot.lane.b32.xlu0 %v1524_v24, %s2018_s24 }
 0x216   : > { %v1094_v25 = vpop.permute.xlu1 %1093  ;;  %v1105_v33 = vpop.permute.xlu0 %1104  ;;  %v1200_v61 = vstv %s1771_s13 }
 0x217   : > { %v1110_v20 = vadd.f32 %v1105_v33, %v1097_v52  ;;  %v1098_v57 = vadd.f32 %v1094_v25, %v1083_v54  ;;  %v1201_v13 = vmul.f32 %v1200_v61, %v2664_v56  ;;  %v1202_v49 = vmul.f32 %v1200_v61, %v2673_v59 }
 0x218   : > { %1530 = vrot.lane.b32.xlu1 %v1525_v63, %s2018_s24  ;;  %1543 = vrot.lane.b32.xlu0 %v1539_v55, %s2019_s6  ;;  %s1772_s24 = sld [smem:[#allocation9 + $0x54]] }
 0x21a   : > { %v1107_v35 = vpop.permute.xlu1 %1106  ;;  %v1120_v37 = vpop.permute.xlu0 %1119 }
 0x21b   : > { %v1125_v38 = vadd.f32 %v1120_v37, %v1110_v20  ;;  %v1111_v41 = vadd.f32 %v1107_v35, %v1098_v57 }
 0x21c   : > { %1545 = vrot.lane.b32.xlu1 %v1540_v14, %s2019_s6  ;;  %1556 = vrot.lane.b32.xlu0 %v1552_v28, %s2019_s6 }
 0x21e   : > { %v1122_v3 = vpop.permute.xlu1 %1121  ;;  %v1133_v50 = vpop.permute.xlu0 %1132  ;;  %v1207_v58 = vstv %s1772_s24 }
 0x21f   : > { %v1138_v30 = vadd.f32 %v1133_v50, %v1125_v38  ;;  %v1126_v62 = vadd.f32 %v1122_v3, %v1111_v41  ;;  %v1208_v11 = vmul.f32 %v1207_v58, %v2676_v45  ;;  %v1209_v24 = vmul.f32 %v1207_v58, %v2686_v6 }
 0x220   : > { %1558 = vrot.lane.b32.xlu1 %v1553_v53, %s2019_s6  ;;  %s1785_s6 = sld [smem:[#allocation9 + $0x2a]] }
 0x222   : > { %v1135_v48 = vpop.permute.xlu1 %1134  ;;  %v1148_v16 = vpop.permute.xlu0 %1147 }
 0x223   : > { %v1153_v8 = vadd.f32 %v1148_v16, %v1138_v30  ;;  %v1139_v31 = vadd.f32 %v1135_v48, %v1126_v62 }
 0x226   : > { %v1150_v23 = vpop.permute.xlu1 %1149  ;;  %v1161_v42 = vpop.permute.xlu0 %1160 }
 0x227   : > { %v1166_v40 = vadd.f32 %v1161_v42, %v1153_v8  ;;  %v1154_v0 = vadd.f32 %v1150_v23, %v1139_v31 }
 0x22a   : > { %v1163_v10 = vpop.permute.xlu1 %1162  ;;  %v1176_v27 = vpop.permute.xlu0 %1175 }
 0x22b   : > { %v1181_v51 = vadd.f32 %v1176_v27, %v1166_v40  ;;  %v1167_v46 = vadd.f32 %v1163_v10, %v1154_v0  ;;  %v1384_v40 = vstv %s1785_s6 }
 0x22e   : > { %v1178_v26 = vpop.permute.xlu1 %1177  ;;  %v1189_v2 = vpop.permute.xlu0 %1188 }
 0x22f   : > { %v1194_v34 = vadd.f32 %v1189_v2, %v1181_v51  ;;  %v1182_v29 = vadd.f32 %v1178_v26, %v1167_v46  ;;  %v1391_v46 = vstv %s1786_s12  ;;  %v1385_v2 = vmul.f32 %v1384_v40, %v2774_v7 }
 0x231   : > { %v1203_v17 = vadd.f32 %v1201_v13, %v1194_v34 }
 0x232   : > { %v1191_v4 = vpop.permute.xlu1 %1190  ;;  %v1220_v18 = vpop.permute.xlu0 %1219 }
 0x233   : > { %v1195_v47 = vadd.f32 %v1191_v4, %v1182_v29  ;;  %v1210_v12 = vadd.f32 %v1208_v11, %v1203_v17  ;;  %v1392_v17 = vmul.f32 %v1391_v46, %v2785_v5  ;;  %v1386_v4 = vmul.f32 %v1384_v40, %v2782_v15 }
 0x235   : > { %v1204_v21 = vadd.f32 %v1202_v49, %v1195_v47  ;;  %v1225_v45 = vadd.f32 %v1220_v18, %v1210_v12  ;;  %v1393_v12 = vmul.f32 %v1391_v46, %v2793_v22 }
 0x236   : > { %v1222_v9 = vpop.permute.xlu1 %1221  ;;  %v1233_v63 = vpop.permute.xlu0 %1232 }
 0x237   : > { %v1211_v25 = vadd.f32 %v1209_v24, %v1204_v21  ;;  %v1238_v39 = vadd.f32 %v1233_v63, %v1225_v45 }
 0x239   : > { %v1226_v59 = vadd.f32 %v1222_v9, %v1211_v25 }
 0x23a   : > { %v1235_v33 = vpop.permute.xlu1 %1234  ;;  %v1248_v55 = vpop.permute.xlu0 %1247 }
 0x23b   : > { %v1253_v32 = vadd.f32 %v1248_v55, %v1238_v39  ;;  %v1239_v53 = vadd.f32 %v1235_v33, %v1226_v59 }
 0x23e   : > { %v1250_v56 = vpop.permute.xlu1 %1249  ;;  %v1261_v19 = vpop.permute.xlu0 %1260 }
 0x23f   : > { %v1266_v43 = vadd.f32 %v1261_v19, %v1253_v32  ;;  %v1254_v50 = vadd.f32 %v1250_v56, %v1239_v53 }
 0x242   : > { %v1263_v60 = vpop.permute.xlu1 %1262  ;;  %v1276_v35 = vpop.permute.xlu0 %1275 }
 0x243   : > { %v1281_v1 = vadd.f32 %v1276_v35, %v1266_v43  ;;  %v1267_v52 = vadd.f32 %v1263_v60, %v1254_v50 }
 0x246   : > { %v1278_v14 = vpop.permute.xlu1 %1277  ;;  %v1289_v36 = vpop.permute.xlu0 %1288 }
 0x247   : > { %v1294_v54 = vadd.f32 %v1289_v36, %v1281_v1  ;;  %v1282_v16 = vadd.f32 %v1278_v14, %v1267_v52 }
 0x24a   : > { %v1291_v37 = vpop.permute.xlu1 %1290  ;;  %v1304_v28 = vpop.permute.xlu0 %1303 }
 0x24b   : > { %v1309_v20 = vadd.f32 %v1304_v28, %v1294_v54  ;;  %v1295_v38 = vadd.f32 %v1291_v37, %v1282_v16 }
 0x24e   : > { %v1306_v3 = vpop.permute.xlu1 %1305  ;;  %v1317_v6 = vpop.permute.xlu0 %1316 }
 0x24f   : > { %v1322_v41 = vadd.f32 %v1317_v6, %v1309_v20  ;;  %v1310_v42 = vadd.f32 %v1306_v3, %v1295_v38 }
 0x252   : > { %v1319_v44 = vpop.permute.xlu1 %1318  ;;  %v1332_v48 = vpop.permute.xlu0 %1331 }
 0x253   : > { %v1337_v30 = vadd.f32 %v1332_v48, %v1322_v41  ;;  %v1323_v8 = vadd.f32 %v1319_v44, %v1310_v42 }
 0x256   : > { %v1334_v57 = vpop.permute.xlu1 %1333  ;;  %v1345_v23 = vpop.permute.xlu0 %1344 }
 0x257   : > { %v1350_v31 = vadd.f32 %v1345_v23, %v1337_v30  ;;  %v1338_v27 = vadd.f32 %v1334_v57, %v1323_v8 }
 0x25a   : > { %v1347_v62 = vpop.permute.xlu1 %1346  ;;  %v1360_v10 = vpop.permute.xlu0 %1359 }
 0x25b   : > { %v1365_v0 = vadd.f32 %v1360_v10, %v1350_v31  ;;  %v1351_v51 = vadd.f32 %v1347_v62, %v1338_v27 }
 0x25e   : > { %v1362_v61 = vpop.permute.xlu1 %1361  ;;  %v1373_v26 = vpop.permute.xlu0 %1372 }
 0x25f   : > { %v1378_v58 = vadd.f32 %v1373_v26, %v1365_v0  ;;  %v1366_v13 = vadd.f32 %v1362_v61, %v1351_v51 }
 0x261   : > { %v1387_v34 = vadd.f32 %v1385_v2, %v1378_v58 }
 0x262   : > { %v1375_v29 = vpop.permute.xlu1 %1374  ;;  %v1404_v49 = vpop.permute.xlu0 %1403 }
 0x263   : > { %v1379_v11 = vadd.f32 %v1375_v29, %v1366_v13  ;;  %v1394_v47 = vadd.f32 %v1392_v17, %v1387_v34  ;;  %v1883_v17 = vld [vmem:[%s2179_s29] sm:$0xff] }
 0x265   : > { %v1388_v18 = vadd.f32 %v1386_v4, %v1379_v11  ;;  %v1409_v5 = vadd.f32 %v1404_v49, %v1394_v47  ;;  %v1884_v11 = vld [vmem:[%s2179_s29 + $0x10] sm:$0xff]  ;;  %v1885_v47 = vld [vmem:[%s2179_s29 + $0x20] sm:$0xff] }
 0x266   : > { %v1406_v21 = vpop.permute.xlu1 %1405  ;;  %v1417_v9 = vpop.permute.xlu0 %1416 }
 0x267   : > { %v1395_v24 = vadd.f32 %v1393_v12, %v1388_v18  ;;  %v1422_v36 = vadd.f32 %v1417_v9, %v1409_v5  ;;  %v1886_v12 = vld [vmem:[%s2179_s29 + $0x30] sm:$0xff]  ;;  %v1887_v9 = vld [vmem:[%s2179_s29 + $0x8] sm:$0xff] }
 0x269   : > { %v1410_v15 = vadd.f32 %v1406_v21, %v1395_v24 }
 0x26a   : > { %v1419_v25 = vpop.permute.xlu1 %1418  ;;  %v1432_v63 = vpop.permute.xlu0 %1431 }
 0x26b   : > { %v1437_v45 = vadd.f32 %v1432_v63, %v1422_v36  ;;  %v1423_v59 = vadd.f32 %v1419_v25, %v1410_v15  ;;  %v1888_v63 = vld [vmem:[%s2179_s29 + $0x18] sm:$0xff] }
 0x26e   : > { %v1434_v7 = vpop.permute.xlu1 %1433  ;;  %v1445_v33 = vpop.permute.xlu0 %1444 }
 0x26f   : > { %v1450_v28 = vadd.f32 %v1445_v33, %v1437_v45  ;;  %v1438_v39 = vadd.f32 %v1434_v7, %v1423_v59  ;;  %v1889_v33 = vld [vmem:[%s2179_s29 + $0x28] sm:$0xff] }
 0x272   : > { %v1447_v55 = vpop.permute.xlu1 %1446  ;;  %v1460_v56 = vpop.permute.xlu0 %1459 }
 0x273   : > { %v1465_v32 = vadd.f32 %v1460_v56, %v1450_v28  ;;  %v1451_v53 = vadd.f32 %v1447_v55, %v1438_v39  ;;  %v1890_v56 = vld [vmem:[%s2179_s29 + $0x38] sm:$0xff] }
 0x276   : > { %v1462_v19 = vpop.permute.xlu1 %1461  ;;  %v1473_v60 = vpop.permute.xlu0 %1472 }
 0x277   : > { %v1478_v43 = vadd.f32 %v1473_v60, %v1465_v32  ;;  %v1466_v50 = vadd.f32 %v1462_v19, %v1451_v53 }
 0x27a   : > { %v1475_v35 = vpop.permute.xlu1 %1474  ;;  %v1488_v14 = vpop.permute.xlu0 %1487 }
 0x27b   : > { %v1493_v1 = vadd.f32 %v1488_v14, %v1478_v43  ;;  %v1479_v52 = vadd.f32 %v1475_v35, %v1466_v50 }
 0x27e   : > { %v1490_v37 = vpop.permute.xlu1 %1489  ;;  %v1501_v22 = vpop.permute.xlu0 %1500 }
 0x27f   : > { %v1506_v54 = vadd.f32 %v1501_v22, %v1493_v1  ;;  %v1494_v16 = vadd.f32 %v1490_v37, %v1479_v52 }
 0x282   : > { %v1503_v3 = vpop.permute.xlu1 %1502  ;;  %v1516_v6 = vpop.permute.xlu0 %1515 }
 0x283   : > { %v1521_v20 = vadd.f32 %v1516_v6, %v1506_v54  ;;  %v1507_v38 = vadd.f32 %v1503_v3, %v1494_v16 }
 0x286   : > { %v1518_v44 = vpop.permute.xlu1 %1517  ;;  %v1529_v48 = vpop.permute.xlu0 %1528 }
 0x287   : > { %v1534_v41 = vadd.f32 %v1529_v48, %v1521_v20  ;;  %v1522_v42 = vadd.f32 %v1518_v44, %v1507_v38 }
 0x28a   : > { %v1531_v57 = vpop.permute.xlu1 %1530  ;;  %v1544_v23 = vpop.permute.xlu0 %1543 }
 0x28b   : > { %v1549_v30 = vadd.f32 %v1544_v23, %v1534_v41  ;;  %v1535_v8 = vadd.f32 %v1531_v57, %v1522_v42 }
 0x28e   : > { %v1546_v62 = vpop.permute.xlu1 %1545  ;;  %v1557_v10 = vpop.permute.xlu0 %1556 }
 0x28f   : > { %v1562_v31 = vadd.f32 %v1557_v10, %v1549_v30  ;;  %v1550_v27 = vadd.f32 %v1546_v62, %v1535_v8 }
 0x291   : > { %v1564_v40 = vsub.f32 0.0, %v1562_v31 }
 0x292   : > { %v1559_v0 = vpop.permute.xlu1 %1558 }
 0x293   : > { %v1563_v61 = vadd.f32 %v1559_v0, %v1550_v27  ;;  %v1566_v51 = vmul.f32 1.442695, %v1564_v40 }
 0x295   : > { %v1565_v26 = vsub.f32 0.0, %v1563_v61  ;;  %1875 = vpow2.f32 %v1566_v51 }
 0x297   : > { %v1568_v46 = vmul.f32 1.442695, %v1565_v26 }
 0x299   : > { %1877 = vpow2.f32 %v1568_v46 }
 0x29f   : > { %v1876_v2 = vpop.eup %1875 }
 0x2a0   : > { %v1570_v58 = vadd.f32 1.0, %v1876_v2 }
 0x2a2   : > { %1879 = vrcp.f32 %v1570_v58 }
 0x2a3   : > { %v1878_v13 = vpop.eup %1877 }
 0x2a4   : > { %v1571_v34 = vadd.f32 1.0, %v1878_v13 }
 0x2a6   : > { %1881 = vrcp.f32 %v1571_v34 }
 0x2ac   : > { %v1880_v29 = vpop.eup %1879 }
 0x2ad   : > { %v1576_v4 = vmul.f32 %v1883_v17, %v1880_v29  ;;  %v1578_v49 = vmul.f32 %v1884_v11, %v1880_v29  ;;  %v1580_v18 = vmul.f32 %v1885_v47, %v1880_v29  ;;  %v1582_v21 = vmul.f32 %v1886_v12, %v1880_v29 }
 0x2af   : > { %1584 = vst.msk [vmem:[%s203_s21] sm:$0xff] %vm212_vm0, %v1576_v4  ;;  %1586 = vst.msk [vmem:[%s203_s21 + $0x10] sm:$0xff] %vm212_vm0, %v1578_v49 }
 0x2b0   : > { %v1882_v24 = vpop.eup %1881  ;;  %1588 = vst.msk [vmem:[%s203_s21 + $0x20] sm:$0xff] %vm212_vm0, %v1580_v18  ;;  %1590 = vst.msk [vmem:[%s203_s21 + $0x30] sm:$0xff] %vm212_vm0, %v1582_v21 }
 0x2b1   : > { %v1577_v25 = vmul.f32 %v1887_v9, %v1882_v24  ;;  %v1579_v7 = vmul.f32 %v1888_v63, %v1882_v24  ;;  %v1581_v55 = vmul.f32 %v1889_v33, %v1882_v24  ;;  %v1583_v19 = vmul.f32 %v1890_v56, %v1882_v24 }
 0x2b3   : > { %1585 = vst.msk [vmem:[%s203_s21 + $0x8] sm:$0xff] %vm212_vm0, %v1577_v25  ;;  %1587 = vst.msk [vmem:[%s203_s21 + $0x18] sm:$0xff] %vm212_vm0, %v1579_v7 }
 0x2b4   : > { %1589 = vst.msk [vmem:[%s203_s21 + $0x28] sm:$0xff] %vm212_vm0, %v1581_v55  ;;  %1591 = vst.msk [vmem:[%s203_s21 + $0x38] sm:$0xff] %vm212_vm0, %v1583_v19 }
 0x2b5   : > { %1949 = shalt.err (!%p1946_p11)
}
 0x2b6   : > { %s1950_s29 = scalar_lea.hbm %s2885_s7, 1024  ;;  %s1954_s10 = scalar_lea.hbm %s2942_s3, 2048 }
 0x2b7   : > { %p1951_p0 = scmp.ne.s32.totalorder %s2885_s7, %s1950_s29  ;;  %p1955_p6 = scmp.lt.u32.totalorder %s2885_s7, %s2942_s3 }
 0x2b8   : > { %p1956_p3 = scmp.lt.u32.totalorder %s1954_s10, %s1950_s29  ;;  %p1958_p5 = scmp.lt.u32.totalorder %s1950_s29, %s2885_s7 }
 0x2b9   : > { %p1952_p2 = pnand %p1951_p0, %p2956_p12 }
 0x2ba   : > { %p1957_p13 = por %p1956_p3, %p1955_p6 }
 0x2bb   : > { %p1953_p7 = pneg %p1952_p2 }
 0x2bc   : > { %p1959_p8 = por %p1958_p5, %p1957_p13 }
 0x2be   : > { %p1960_p9 = pnand %p1959_p8, %p1953_p7 }
 0x2c0   : > { %1963 = shalt.err (!%p1960_p9)
}
 0x2c1   : > { %s2021_s6 = smov 128   ;;  %s2022_s12 = smov 8  }
 0x2c2   : > { %1812 = dma.vmem_to_hbm [thread:$0]  (%p2956_p12), %s2887_s30, 1024, %s2885_s7, %s1593_s8, %s2021_s6, %s2021_s6, %s2022_s12  }
 0x2c3 PF: > { %s1621_s20 = sand.u32 1, %s1994_s14   ;;  %p2957_p10 = scmp.ne.s32.totalorder %s2949_s26, 0 }
 0x2c4   : > { %p2958_p1 = scmp.ge.s32.totalorder %s2006_s17, 2  ;;  %s1622_s21 = scalar_lea.sflag [#allocation7], %s1621_s20 }
 0x2c6   : > { %p1823_p4 = pnand %p2958_p1, %p2957_p10 }
 0x2c8   : > { %1989 = dma.done.wait (!%p1823_p4), %s1622_s21, 1024  }
 0x2c9   : > { %1991 = vsyncadd (!%p1823_p4), %s1622_s21, 4294966272  ;;  %p18_p11 = scmp.ge.s32.totalorder %s2071_s19, 4   ;;  %s2959_s14 = smov %s1998_s15 }
 0x2ca   : > { %s2960_s15 = smov %s2002_s16  ;;  %s2961_s16 = smov %s2083_s22 }
 0x2cb   : > { %s2962_s17 = smov %s2071_s19  ;;  %20 = sbr.rel (!%p18_p11) target bundleno = 8 (0x8), region = 82 }
 0x2d2   :  { %1627 = vsyncpa [#allocation6], 1 }
 0x2d3   :  { %1629 = vsyncpa [#allocation6 + $0x1], 1 }
 0x2d4   :  { %1630 = vsyncpa [#allocation7], 1 }
 0x2d5   :  { %1632 = vsyncpa [#allocation7 + $0x1], 1 }
 0x2d6   :  { %1633 = vsyncpa [#allocation8], 1 }
 0x2d7   :  { %1635 = vsyncpa [#allocation8 + $0x1], 1 }

</bundles_post_ra>
